<compile_context>
chip_gen: v6e
topology: v6e:2x2x1
jax: 0.10.0
libtpu: 0.0.40
codegen_flags: <defaults>
</compile_context>

<pallas_src>
import functools
import math

import jax
import jax.numpy as jnp
from jax import lax
from jax.experimental import pallas as pl
from jax.experimental.pallas import tpu as pltpu

PARAM_ORDER = ("n1w", "n1b", "wq", "wk", "wv", "bq", "bk", "bv", "wo", "bo",
               "gwx", "gwa", "gb", "gnw", "gnb", "n2w", "n2b", "w1", "b1", "w2", "b2")
# 2-D matmul weights: stored bf16 in HBM (halves weight DMA); biases/LN stay f32.
MATMUL_WEIGHTS = ("wq", "wk", "wv", "wo", "gwx", "gwa", "w1", "w2")


def _expert_kernel(x_ref, n1w, n1b, wq, wk, wv, bq, bk, bv, wo, bo,
                   gwx, gwa, gb, gnw, gnb, n2w, n2b, w1, b1, w2, b2, tag_ref,
                   o_ref, x_sc, ctx_sc, *, nhead, batch):
    """Grid = (L,).  One grid step = one Expert layer applied to the WHOLE
    batch (B folded into the matmul row dim), so each layer's weights are
    DMA'd once and reused across all batch elements.  The residual stream is
    carried in an f32 VMEM scratch across the layer axis."""
    f32, bf16 = jnp.float32, jnp.bfloat16
    l = pl.program_id(0)

    @pl.when(l == 0)
    def _():                                          # load the input once
        x_sc[...] = x_ref[...].astype(f32)

    x = x_sc[...]                                     # (R, E) f32 residual stream, R = B*S
    R, E = x.shape
    B = batch
    S = R // B
    Dh = E // nhead

    def ln(v, w_r, b_r):                              # LayerNorm over last dim, eps=1e-5 (f32 stats)
        mu = jnp.mean(v, axis=-1, keepdims=True)
        c = v - mu
        var = jnp.mean(c * c, axis=-1, keepdims=True)
        return c * lax.rsqrt(var + 1e-5) * w_r[...] + b_r[...]

    def mm(a_bf16, w):                                # bf16 x bf16 -> f32 MXU accumulation
        return jnp.dot(a_bf16, w, preferred_element_type=f32)

    # ---- norm1 ----
    xn1 = ln(x, n1w, n1b)
    xn1_b = xn1.astype(bf16)                          # cast once, reused by q/k/v/gate matmuls

    # ---- GatedAttention: multi-head self-attention (dropout = identity) ----
    # wq/wk/wv are stored per-head (nhead, E, Dh): the kernel never lane-slices
    # q/k/v at non-128-aligned offsets.  Each head's context goes (bf16) into a
    # preallocated (R, E) scratch slab; ONE full-width out-projection follows.
    # 1/sqrt(Dh) is pre-folded into wq/bq at parameter-prep time.
    # TODO(synk): for large nhead use lax.fori_loop(unroll=k) and pack several
    #             heads per MXU op (Dh=64 only uses a fraction of MXU depth).
    for h in range(nhead):                            # nhead is small and static
        qh = (mm(xn1_b, wq[h]) + bq[h]).astype(bf16).reshape(B, S, Dh)
        kh = (mm(xn1_b, wk[h]) + bk[h]).astype(bf16).reshape(B, S, Dh)
        vh = (mm(xn1_b, wv[h]) + bv[h]).astype(bf16).reshape(B, S, Dh)
        s = jnp.einsum("bqd,bkd->bqk", qh, kh, preferred_element_type=f32)  # (B,S,S)
        s = s - jnp.max(s, axis=-1, keepdims=True)
        p = jnp.exp(s)
        p = p * pl.reciprocal(jnp.sum(p, axis=-1, keepdims=True), approx=True)
        ctxh = jnp.einsum("bqk,bkd->bqd", p.astype(bf16), vh,
                          preferred_element_type=f32)                        # (B,S,Dh)
        ctx_sc[:, h * Dh:(h + 1) * Dh] = ctxh.reshape(R, Dh).astype(bf16)

    attn = mm(ctx_sc[...], wo[...]) + bo[...]         # single full-width out-projection

    # ---- gate: sigmoid(Linear(cat([xn1, attn], -1))) * attn  (split into 2 matmuls)
    g = jax.nn.sigmoid(mm(xn1_b, gwx[...]) + mm(attn.astype(bf16), gwa[...]) + gb[...])
    attn_block = ln(xn1 + g * attn, gnw, gnb)         # GatedAttention's LayerNorm

    # ---- residual + norm2 + FFN ----
    x = x + attn_block
    xn2 = ln(x, n2w, n2b)
    h1 = mm(xn2.astype(bf16), w1[...]) + b1[...]
    # exact GELU (torch nn.GELU default).
    # TODO(synk): jax.nn.gelu(approximate=True) would move this onto the EUP slot.
    h1 = 0.5 * h1 * (1.0 + lax.erf(h1 * (1.0 / math.sqrt(2.0))))
    x = x + mm(h1.astype(bf16), w2[...]) + b2[...]

    x_sc[...] = x                                     # carry residual to next layer step

    @pl.when(l == pl.num_programs(0) - 1)
    def _():                                          # fused specialization_tag add
        o_ref[...] = (x + tag_ref[...]).astype(o_ref.dtype)


def stack_and_prepare(layers, nhead):
    """Stack per-layer params along a leading L axis; split the q/k/v
    projections per head ((L, nhead, E, Dh) / (L, nhead, 1, Dh)); fold the
    softmax scale into the q projection; store matmul weights as bf16."""
    E = layers[0]["wq"].shape[0]
    Dh = E // nhead
    scale = 1.0 / math.sqrt(Dh)
    stacked = {}
    for name in PARAM_ORDER:
        arr = jnp.stack([p[name] for p in layers], axis=0)
        L = arr.shape[0]
        if name in ("wq", "bq"):
            arr = arr * scale                         # fold 1/sqrt(Dh) into q projection
        if name in ("wq", "wk", "wv"):                # (L,E,E) -> (L,nhead,E,Dh)
            arr = jnp.transpose(arr.reshape(L, E, nhead, Dh), (0, 2, 1, 3))
        elif name in ("bq", "bk", "bv"):              # (L,1,E) -> (L,nhead,1,Dh)
            arr = arr.reshape(L, nhead, 1, Dh)
        if name in MATMUL_WEIGHTS:
            arr = arr.astype(jnp.bfloat16)
        stacked[name] = arr
    return stacked


def expert_pallas_call(x, stacked, tag, nhead):
    B, S, E = x.shape
    L = stacked["wo"].shape[0]
    F = stacked["w1"].shape[2]
    R = B * S

    x2 = x.reshape(R, E)                              # fold batch into matmul rows
    tag2 = tag.reshape(1, E)

    def wspec(arr):                                   # per-layer weight tile, indexed by layer axis
        trailing = tuple(arr.shape[1:])
        nd = len(trailing)
        return pl.BlockSpec((None,) + trailing,
                            lambda l, _nd=nd: (l,) + (0,) * _nd)

    in_specs = [pl.BlockSpec((R, E), lambda l: (0, 0))]       # x: same block every step -> DMA'd once
    in_specs += [wspec(stacked[name]) for name in PARAM_ORDER]
    in_specs += [pl.BlockSpec((1, E), lambda l: (0, 0))]      # specialization tag
    out_spec = pl.BlockSpec((R, E), lambda l: (0, 0))

    # VMEM budget (generation-aware): double-buffered per-layer weights,
    # x/o/tag blocks, scratch, activation working set and compiler headroom.
    per_layer_w = sum(int(stacked[n].size // L) * stacked[n].dtype.itemsize
                      for n in PARAM_ORDER)
    io_bytes = 2 * 2 * R * E * x.dtype.itemsize + 2 * E * 4
    scratch_bytes = R * E * 4 + R * E * 2             # x_sc (f32) + ctx_sc (bf16)
    act_bytes = 4 * R * (8 * E + 2 * F) + 4 * B * S * S
    needed = 2 * per_layer_w + io_bytes + scratch_bytes + act_bytes + (2 << 20)
    try:
        vmem_cap = int(pltpu.get_tpu_info().vmem_capacity_bytes)
    except Exception:                                 # emulator / unknown chip
        vmem_cap = 64 * 2**20
    vmem_limit = int(min(vmem_cap - 16 * 2**20,       # ~112 MiB on v5e/v6e, ~48 MiB on v7x
                         max(16 * 2**20, needed)))

    out = pl.pallas_call(
        functools.partial(_expert_kernel, nhead=nhead, batch=B),
        grid_spec=pltpu.PrefetchScalarGridSpec(
            num_scalar_prefetch=0,
            grid=(L,),                                # layer axis: next layer's weight DMA overlaps compute
            in_specs=in_specs,
            out_specs=out_spec,
            scratch_shapes=[pltpu.VMEM((R, E), jnp.float32),
                            pltpu.VMEM((R, E), jnp.bfloat16)]),
        out_shape=jax.ShapeDtypeStruct((R, E), x.dtype),
        compiler_params=pltpu.CompilerParams(
            dimension_semantics=("arbitrary",),
            vmem_limit_bytes=vmem_limit),
    )(x2, *[stacked[name] for name in PARAM_ORDER], tag2)
    return out.reshape(B, S, E)


@functools.partial(jax.jit, static_argnames=("nhead",))
def expert_forward(x, stacked, tag, nhead):
    return expert_pallas_call(x, stacked, tag, nhead)   # tag add is fused into the kernel epilogue


def init_expert_params(key, embed_dim, nhead, dim_feedforward, num_layers):
    """Deterministic synthetic parameters; stored pre-transposed / pre-split
    for the kernel (PyTorch layouts noted inline)."""
    E, F = embed_dim, dim_feedforward
    ones = jnp.ones((1, E), jnp.float32)
    zeros = jnp.zeros((1, E), jnp.float32)
    layers = []
    for l in range(num_layers):
        ks = jax.random.split(jax.random.fold_in(key, l), 10)
        nrm = lambda k, shape, s=0.05: s * jax.random.normal(k, shape, jnp.float32)
        in_proj_w = nrm(ks[0], (3 * E, E))            # torch: (3E, E)
        in_proj_b = nrm(ks[1], (3 * E,), 0.02)
        out_proj_w = nrm(ks[2], (E, E))               # torch: (E, E)
        out_proj_b = nrm(ks[3], (E,), 0.02)
        gate_w = nrm(ks[4], (E, 2 * E))               # torch: (E, 2E)
        gate_b = nrm(ks[5], (E,), 0.02)
        ffn_w1 = nrm(ks[6], (F, E))                   # torch: (F, E)
        ffn_b1 = nrm(ks[7], (F,), 0.02)
        ffn_w2 = nrm(ks[8], (E, F))                   # torch: (E, F)
        ffn_b2 = nrm(ks[9], (E,), 0.02)
        layers.append({
            "n1w": ones, "n1b": zeros,
            "wq": in_proj_w[:E].T, "wk": in_proj_w[E:2 * E].T, "wv": in_proj_w[2 * E:].T,
            "bq": in_proj_b[:E].reshape(1, E),
            "bk": in_proj_b[E:2 * E].reshape(1, E),
            "bv": in_proj_b[2 * E:].reshape(1, E),
            "wo": out_proj_w.T, "bo": out_proj_b.reshape(1, E),
            "gwx": gate_w[:, :E].T, "gwa": gate_w[:, E:].T, "gb": gate_b.reshape(1, E),
            "gnw": ones, "gnb": zeros,
            "n2w": ones, "n2b": zeros,
            "w1": ffn_w1.T, "b1": ffn_b1.reshape(1, F),
            "w2": ffn_w2.T, "b2": ffn_b2.reshape(1, E),
        })
    tag = 0.01 * jax.random.normal(jax.random.fold_in(key, 10_000), (1, 1, E), jnp.float32)
    return layers, tag


def expert_forward_ref(x, layers, tag, nhead):
    """Plain-JAX f32 reference (mirrors the PyTorch eval-mode forward)."""
    def ln(v, w, b):
        mu = jnp.mean(v, axis=-1, keepdims=True)
        var = jnp.mean((v - mu) ** 2, axis=-1, keepdims=True)
        return (v - mu) / jnp.sqrt(var + 1e-5) * w + b

    B, S, E = x.shape
    Dh = E // nhead
    for p in layers:
        xn1 = ln(x, p["n1w"], p["n1b"])
        q = xn1 @ p["wq"] + p["bq"]
        k = xn1 @ p["wk"] + p["bk"]
        v = xn1 @ p["wv"] + p["bv"]
        qh = q.reshape(B, S, nhead, Dh).transpose(0, 2, 1, 3)
        kh = k.reshape(B, S, nhead, Dh).transpose(0, 2, 1, 3)
        vh = v.reshape(B, S, nhead, Dh).transpose(0, 2, 1, 3)
        s = jnp.einsum("bhqd,bhkd->bhqk", qh, kh) / math.sqrt(Dh)
        pr = jax.nn.softmax(s, axis=-1)
        oh = jnp.einsum("bhqk,bhkd->bhqd", pr, vh).transpose(0, 2, 1, 3).reshape(B, S, E)
        attn = oh @ p["wo"] + p["bo"]
        g = jax.nn.sigmoid(xn1 @ p["gwx"] + attn @ p["gwa"] + p["gb"])
        x = x + ln(xn1 + g * attn, p["gnw"], p["gnb"])
        xn2 = ln(x, p["n2w"], p["n2b"])
        h1 = xn2 @ p["w1"] + p["b1"]
        h1 = 0.5 * h1 * (1.0 + lax.erf(h1 / math.sqrt(2.0)))
        x = x + h1 @ p["w2"] + p["b2"]
    return x + tag


if __name__ == "__main__":
    embed_dim, nhead, dim_feedforward, num_layers = 32, 4, 64, 4
    B, S = 2, 8

    key = jax.random.PRNGKey(0)
    kx, kp = jax.random.split(key)
    x = jax.random.normal(kx, (B, S, embed_dim), jnp.float32)
    layers, tag = init_expert_params(kp, embed_dim, nhead, dim_feedforward, num_layers)
    stacked = stack_and_prepare(layers, nhead)

    out = expert_forward(x, stacked, tag, nhead=nhead)
    out = jax.block_until_ready(out)
    assert out.shape == (B, S, embed_dim)

    ref = expert_forward_ref(x, layers, tag, nhead)
    err = float(jnp.max(jnp.abs(out - ref)))
    # bf16 matmul inputs / bf16 weights (f32 accumulation) + approx reciprocal
    # vs. the pure-f32 reference.
    assert jnp.allclose(out, ref, atol=2e-2, rtol=2e-2), f"max abs err {err}"

    print("KERNEL_OK")
</pallas_src>

<mosaic_0001>
module attributes {stable_mosaic.version = 11 : i64} {
  func.func @_expert_kernel(%arg0: i32, %arg1: memref<16x32xf32, #tpu.memory_space<vmem>>, %arg2: memref<1x1x32xf32, #tpu.memory_space<vmem>>, %arg3: memref<1x1x32xf32, #tpu.memory_space<vmem>>, %arg4: memref<1x4x32x8xbf16, #tpu.memory_space<vmem>>, %arg5: memref<1x4x32x8xbf16, #tpu.memory_space<vmem>>, %arg6: memref<1x4x32x8xbf16, #tpu.memory_space<vmem>>, %arg7: memref<1x4x1x8xf32, #tpu.memory_space<vmem>>, %arg8: memref<1x4x1x8xf32, #tpu.memory_space<vmem>>, %arg9: memref<1x4x1x8xf32, #tpu.memory_space<vmem>>, %arg10: memref<1x32x32xbf16, #tpu.memory_space<vmem>>, %arg11: memref<1x1x32xf32, #tpu.memory_space<vmem>>, %arg12: memref<1x32x32xbf16, #tpu.memory_space<vmem>>, %arg13: memref<1x32x32xbf16, #tpu.memory_space<vmem>>, %arg14: memref<1x1x32xf32, #tpu.memory_space<vmem>>, %arg15: memref<1x1x32xf32, #tpu.memory_space<vmem>>, %arg16: memref<1x1x32xf32, #tpu.memory_space<vmem>>, %arg17: memref<1x1x32xf32, #tpu.memory_space<vmem>>, %arg18: memref<1x1x32xf32, #tpu.memory_space<vmem>>, %arg19: memref<1x32x64xbf16, #tpu.memory_space<vmem>>, %arg20: memref<1x1x64xf32, #tpu.memory_space<vmem>>, %arg21: memref<1x64x32xbf16, #tpu.memory_space<vmem>>, %arg22: memref<1x1x32xf32, #tpu.memory_space<vmem>>, %arg23: memref<1x32xf32, #tpu.memory_space<vmem>>, %arg24: memref<16x32xf32, #tpu.memory_space<vmem>>, %arg25: memref<16x32xf32, #tpu.memory_space<vmem>>, %arg26: memref<16x32xbf16, #tpu.memory_space<vmem>>) attributes {dimension_semantics = [#tpu.dimension_semantics<arbitrary>], iteration_bounds = array<i64: 4>, scalar_prefetch = 0 : i64, scratch_operands = 2 : i64, tpu.core_type = #tpu.core_type<tc>, window_params = [{pipeline_mode = #tpu.pipeline_mode<synchronous>, transform_indices = @transform_0, window_bounds = array<i64: 16, 32>}, {transform_indices = @transform_1, window_bounds = array<i64: 1, 1, 32>}, {transform_indices = @transform_2, window_bounds = array<i64: 1, 1, 32>}, {transform_indices = @transform_3, window_bounds = array<i64: 1, 4, 32, 8>}, {transform_indices = @transform_4, window_bounds = array<i64: 1, 4, 32, 8>}, {transform_indices = @transform_5, window_bounds = array<i64: 1, 4, 32, 8>}, {transform_indices = @transform_6, window_bounds = array<i64: 1, 4, 1, 8>}, {transform_indices = @transform_7, window_bounds = array<i64: 1, 4, 1, 8>}, {transform_indices = @transform_8, window_bounds = array<i64: 1, 4, 1, 8>}, {transform_indices = @transform_9, window_bounds = array<i64: 1, 32, 32>}, {transform_indices = @transform_10, window_bounds = array<i64: 1, 1, 32>}, {transform_indices = @transform_11, window_bounds = array<i64: 1, 32, 32>}, {transform_indices = @transform_12, window_bounds = array<i64: 1, 32, 32>}, {transform_indices = @transform_13, window_bounds = array<i64: 1, 1, 32>}, {transform_indices = @transform_14, window_bounds = array<i64: 1, 1, 32>}, {transform_indices = @transform_15, window_bounds = array<i64: 1, 1, 32>}, {transform_indices = @transform_16, window_bounds = array<i64: 1, 1, 32>}, {transform_indices = @transform_17, window_bounds = array<i64: 1, 1, 32>}, {transform_indices = @transform_18, window_bounds = array<i64: 1, 32, 64>}, {transform_indices = @transform_19, window_bounds = array<i64: 1, 1, 64>}, {transform_indices = @transform_20, window_bounds = array<i64: 1, 64, 32>}, {transform_indices = @transform_21, window_bounds = array<i64: 1, 1, 32>}, {pipeline_mode = #tpu.pipeline_mode<synchronous>, transform_indices = @transform_22, window_bounds = array<i64: 1, 32>}, {pipeline_mode = #tpu.pipeline_mode<synchronous>, transform_indices = @transform_23, window_bounds = array<i64: 16, 32>}]} {
    %c0_i32 = arith.constant 0 : i32
    %0 = arith.cmpi eq, %arg0, %c0_i32 : i32
    %1 = arith.extui %0 : i1 to i32
    %c0_i32_0 = arith.constant 0 : i32
    %2 = arith.cmpi ne, %1, %c0_i32_0 : i32
    scf.if %2 {
      %c0_201 = arith.constant 0 : index
      %c0_202 = arith.constant 0 : index
      %306 = vector.load %arg1[%c0_201, %c0_202] : memref<16x32xf32, #tpu.memory_space<vmem>>, vector<16x32xf32>
      %c0_203 = arith.constant 0 : index
      %c0_204 = arith.constant 0 : index
      %307 = vector.load %arg25[%c0_203, %c0_204] : memref<16x32xf32, #tpu.memory_space<vmem>>, vector<16x32xf32>
      tpu.vector_store %arg25[%c0_203, %c0_204], %306 {strides = array<i32>} : memref<16x32xf32, #tpu.memory_space<vmem>>, vector<16x32xf32>,
    } else {
    }
    %c0 = arith.constant 0 : index
    %c0_1 = arith.constant 0 : index
    %3 = vector.load %arg25[%c0, %c0_1] : memref<16x32xf32, #tpu.memory_space<vmem>>, vector<16x32xf32>
    %cst = arith.constant dense<0.000000e+00> : vector<16xf32>
    %4 = vector.multi_reduction <add>, %3, %cst [1] : vector<16x32xf32> to vector<16xf32>
    %5 = vector.shape_cast %4 : vector<16xf32> to vector<16x1xf32>
    %cst_2 = arith.constant 3.200000e+01 : f32
    %6 = vector.broadcast %cst_2 : f32 to vector<16x1xf32>
    %7 = arith.divf %5, %6 : vector<16x1xf32>
    %8 = vector.broadcast %7 : vector<16x1xf32> to vector<16x32xf32>
    %9 = arith.subf %3, %8 : vector<16x32xf32>
    %10 = arith.mulf %9, %9 : vector<16x32xf32>
    %cst_3 = arith.constant dense<0.000000e+00> : vector<16xf32>
    %11 = vector.multi_reduction <add>, %10, %cst_3 [1] : vector<16x32xf32> to vector<16xf32>
    %12 = vector.shape_cast %11 : vector<16xf32> to vector<16x1xf32>
    %cst_4 = arith.constant 3.200000e+01 : f32
    %13 = vector.broadcast %cst_4 : f32 to vector<16x1xf32>
    %14 = arith.divf %12, %13 : vector<16x1xf32>
    %cst_5 = arith.constant 9.99999974E-6 : f32
    %15 = vector.broadcast %cst_5 : f32 to vector<16x1xf32>
    %16 = arith.addf %14, %15 : vector<16x1xf32>
    %17 = math.rsqrt %16 : vector<16x1xf32>
    %18 = vector.broadcast %17 : vector<16x1xf32> to vector<16x32xf32>
    %19 = arith.mulf %9, %18 : vector<16x32xf32>
    %c0_6 = arith.constant 0 : index
    %c0_7 = arith.constant 0 : index
    %c0_8 = arith.constant 0 : index
    %20 = vector.load %arg2[%c0_6, %c0_7, %c0_8] : memref<1x1x32xf32, #tpu.memory_space<vmem>>, vector<1x1x32xf32>
    %21 = vector.shape_cast %20 : vector<1x1x32xf32> to vector<1x32xf32>
    %22 = vector.broadcast %21 : vector<1x32xf32> to vector<16x32xf32>
    %23 = arith.mulf %19, %22 : vector<16x32xf32>
    %c0_9 = arith.constant 0 : index
    %c0_10 = arith.constant 0 : index
    %c0_11 = arith.constant 0 : index
    %24 = vector.load %arg3[%c0_9, %c0_10, %c0_11] : memref<1x1x32xf32, #tpu.memory_space<vmem>>, vector<1x1x32xf32>
    %25 = vector.shape_cast %24 : vector<1x1x32xf32> to vector<1x32xf32>
    %26 = vector.broadcast %25 : vector<1x32xf32> to vector<16x32xf32>
    %27 = arith.addf %23, %26 : vector<16x32xf32>
    %28 = arith.truncf %27 : vector<16x32xf32> to vector<16x32xbf16>
    %c0_12 = arith.constant 0 : index
    %c0_13 = arith.constant 0 : index
    %c0_14 = arith.constant 0 : index
    %c0_15 = arith.constant 0 : index
    %29 = vector.load %arg4[%c0_12, %c0_13, %c0_14, %c0_15] : memref<1x4x32x8xbf16, #tpu.memory_space<vmem>>, vector<1x1x32x8xbf16>
    %30 = vector.shape_cast %29 : vector<1x1x32x8xbf16> to vector<32x8xbf16>
    %cst_16 = arith.constant dense<0.000000e+00> : vector<16x8xf32>
    %31 = tpu.matmul %28, %30, %cst_16 {dimension_numbers = #tpu.dot_dimension_numbers<[1], [0], [0], [1], [0, 0, 1, 1], [], []>} : vector<16x32xbf16>, vector<32x8xbf16>, vector<16x8xf32> -> vector<16x8xf32>
    %c0_17 = arith.constant 0 : index
    %c0_18 = arith.constant 0 : index
    %c0_19 = arith.constant 0 : index
    %c0_20 = arith.constant 0 : index
    %32 = vector.load %arg7[%c0_17, %c0_18, %c0_19, %c0_20] : memref<1x4x1x8xf32, #tpu.memory_space<vmem>>, vector<1x1x1x8xf32>
    %33 = vector.shape_cast %32 : vector<1x1x1x8xf32> to vector<1x8xf32>
    %34 = vector.broadcast %33 : vector<1x8xf32> to vector<16x8xf32>
    %35 = arith.addf %31, %34 : vector<16x8xf32>
    %36 = arith.truncf %35 : vector<16x8xf32> to vector<16x8xbf16>
    %37 = vector.shape_cast %36 : vector<16x8xbf16> to vector<2x8x8xbf16>
    %c0_21 = arith.constant 0 : index
    %c0_22 = arith.constant 0 : index
    %c0_23 = arith.constant 0 : index
    %c0_24 = arith.constant 0 : index
    %38 = vector.load %arg5[%c0_21, %c0_22, %c0_23, %c0_24] : memref<1x4x32x8xbf16, #tpu.memory_space<vmem>>, vector<1x1x32x8xbf16>
    %39 = vector.shape_cast %38 : vector<1x1x32x8xbf16> to vector<32x8xbf16>
    %cst_25 = arith.constant dense<0.000000e+00> : vector<16x8xf32>
    %40 = tpu.matmul %28, %39, %cst_25 {dimension_numbers = #tpu.dot_dimension_numbers<[1], [0], [0], [1], [0, 0, 1, 1], [], []>} : vector<16x32xbf16>, vector<32x8xbf16>, vector<16x8xf32> -> vector<16x8xf32>
    %c0_26 = arith.constant 0 : index
    %c0_27 = arith.constant 0 : index
    %c0_28 = arith.constant 0 : index
    %c0_29 = arith.constant 0 : index
    %41 = vector.load %arg8[%c0_26, %c0_27, %c0_28, %c0_29] : memref<1x4x1x8xf32, #tpu.memory_space<vmem>>, vector<1x1x1x8xf32>
    %42 = vector.shape_cast %41 : vector<1x1x1x8xf32> to vector<1x8xf32>
    %43 = vector.broadcast %42 : vector<1x8xf32> to vector<16x8xf32>
    %44 = arith.addf %40, %43 : vector<16x8xf32>
    %45 = arith.truncf %44 : vector<16x8xf32> to vector<16x8xbf16>
    %46 = vector.shape_cast %45 : vector<16x8xbf16> to vector<2x8x8xbf16>
    %c0_30 = arith.constant 0 : index
    %c0_31 = arith.constant 0 : index
    %c0_32 = arith.constant 0 : index
    %c0_33 = arith.constant 0 : index
    %47 = vector.load %arg6[%c0_30, %c0_31, %c0_32, %c0_33] : memref<1x4x32x8xbf16, #tpu.memory_space<vmem>>, vector<1x1x32x8xbf16>
    %48 = vector.shape_cast %47 : vector<1x1x32x8xbf16> to vector<32x8xbf16>
    %cst_34 = arith.constant dense<0.000000e+00> : vector<16x8xf32>
    %49 = tpu.matmul %28, %48, %cst_34 {dimension_numbers = #tpu.dot_dimension_numbers<[1], [0], [0], [1], [0, 0, 1, 1], [], []>} : vector<16x32xbf16>, vector<32x8xbf16>, vector<16x8xf32> -> vector<16x8xf32>
    %c0_35 = arith.constant 0 : index
    %c0_36 = arith.constant 0 : index
    %c0_37 = arith.constant 0 : index
    %c0_38 = arith.constant 0 : index
    %50 = vector.load %arg9[%c0_35, %c0_36, %c0_37, %c0_38] : memref<1x4x1x8xf32, #tpu.memory_space<vmem>>, vector<1x1x1x8xf32>
    %51 = vector.shape_cast %50 : vector<1x1x1x8xf32> to vector<1x8xf32>
    %52 = vector.broadcast %51 : vector<1x8xf32> to vector<16x8xf32>
    %53 = arith.addf %49, %52 : vector<16x8xf32>
    %54 = arith.truncf %53 : vector<16x8xf32> to vector<16x8xbf16>
    %55 = vector.shape_cast %54 : vector<16x8xbf16> to vector<2x8x8xbf16>
    "tpu.trace_start"() <{level = 10 : i32, message = "bqd,bkd->bqk"}> : () -> ()
    %cst_39 = arith.constant dense<0.000000e+00> : vector<2x8x8xf32>
    %56 = tpu.matmul %37, %46, %cst_39 {dimension_numbers = #tpu.dot_dimension_numbers<[2], [2], [1], [1], [0, 0, 0, 1, 1, 1], [0], [0]>} : vector<2x8x8xbf16>, vector<2x8x8xbf16>, vector<2x8x8xf32> -> vector<2x8x8xf32>
    "tpu.trace_stop"() : () -> ()
    %cst_40 = arith.constant dense<0xFF800000> : vector<2x8xf32>
    %57 = vector.multi_reduction <maximumf>, %56, %cst_40 [2] : vector<2x8x8xf32> to vector<2x8xf32>
    %58 = vector.shape_cast %57 : vector<2x8xf32> to vector<2x8x1xf32>
    %59 = vector.broadcast %58 : vector<2x8x1xf32> to vector<2x8x8xf32>
    %60 = arith.subf %56, %59 : vector<2x8x8xf32>
    %61 = math.exp %60 : vector<2x8x8xf32>
    %cst_41 = arith.constant dense<0.000000e+00> : vector<2x8xf32>
    %62 = vector.multi_reduction <add>, %61, %cst_41 [2] : vector<2x8x8xf32> to vector<2x8xf32>
    %63 = vector.shape_cast %62 : vector<2x8xf32> to vector<2x8x1xf32>
    %64 = tpu.reciprocal %63 {approx = true} : vector<2x8x1xf32> -> vector<2x8x1xf32>
    %65 = vector.broadcast %64 : vector<2x8x1xf32> to vector<2x8x8xf32>
    %66 = arith.mulf %61, %65 : vector<2x8x8xf32>
    %67 = arith.truncf %66 : vector<2x8x8xf32> to vector<2x8x8xbf16>
    "tpu.trace_start"() <{level = 10 : i32, message = "bqk,bkd->bqd"}> : () -> ()
    %cst_42 = arith.constant dense<0.000000e+00> : vector<2x8x8xf32>
    %68 = tpu.matmul %67, %55, %cst_42 {dimension_numbers = #tpu.dot_dimension_numbers<[2], [1], [1], [2], [0, 0, 0, 1, 1, 2], [0], [0]>} : vector<2x8x8xbf16>, vector<2x8x8xbf16>, vector<2x8x8xf32> -> vector<2x8x8xf32>
    "tpu.trace_stop"() : () -> ()
    %69 = vector.shape_cast %68 : vector<2x8x8xf32> to vector<16x8xf32>
    %70 = arith.truncf %69 : vector<16x8xf32> to vector<16x8xbf16>
    %c0_43 = arith.constant 0 : index
    %c0_44 = arith.constant 0 : index
    %71 = vector.load %arg26[%c0_43, %c0_44] : memref<16x32xbf16, #tpu.memory_space<vmem>>, vector<16x8xbf16>
    tpu.vector_store %arg26[%c0_43, %c0_44], %70 {strides = array<i32>} : memref<16x32xbf16, #tpu.memory_space<vmem>>, vector<16x8xbf16>,
    %c0_45 = arith.constant 0 : index
    %c1 = arith.constant 1 : index
    %c0_46 = arith.constant 0 : index
    %c0_47 = arith.constant 0 : index
    %72 = vector.load %arg4[%c0_45, %c1, %c0_46, %c0_47] : memref<1x4x32x8xbf16, #tpu.memory_space<vmem>>, vector<1x1x32x8xbf16>
    %73 = vector.shape_cast %72 : vector<1x1x32x8xbf16> to vector<32x8xbf16>
    %cst_48 = arith.constant dense<0.000000e+00> : vector<16x8xf32>
    %74 = tpu.matmul %28, %73, %cst_48 {dimension_numbers = #tpu.dot_dimension_numbers<[1], [0], [0], [1], [0, 0, 1, 1], [], []>} : vector<16x32xbf16>, vector<32x8xbf16>, vector<16x8xf32> -> vector<16x8xf32>
    %c0_49 = arith.constant 0 : index
    %c1_50 = arith.constant 1 : index
    %c0_51 = arith.constant 0 : index
    %c0_52 = arith.constant 0 : index
    %75 = vector.load %arg7[%c0_49, %c1_50, %c0_51, %c0_52] : memref<1x4x1x8xf32, #tpu.memory_space<vmem>>, vector<1x1x1x8xf32>
    %76 = vector.shape_cast %75 : vector<1x1x1x8xf32> to vector<1x8xf32>
    %77 = vector.broadcast %76 : vector<1x8xf32> to vector<16x8xf32>
    %78 = arith.addf %74, %77 : vector<16x8xf32>
    %79 = arith.truncf %78 : vector<16x8xf32> to vector<16x8xbf16>
    %80 = vector.shape_cast %79 : vector<16x8xbf16> to vector<2x8x8xbf16>
    %c0_53 = arith.constant 0 : index
    %c1_54 = arith.constant 1 : index
    %c0_55 = arith.constant 0 : index
    %c0_56 = arith.constant 0 : index
    %81 = vector.load %arg5[%c0_53, %c1_54, %c0_55, %c0_56] : memref<1x4x32x8xbf16, #tpu.memory_space<vmem>>, vector<1x1x32x8xbf16>
    %82 = vector.shape_cast %81 : vector<1x1x32x8xbf16> to vector<32x8xbf16>
    %cst_57 = arith.constant dense<0.000000e+00> : vector<16x8xf32>
    %83 = tpu.matmul %28, %82, %cst_57 {dimension_numbers = #tpu.dot_dimension_numbers<[1], [0], [0], [1], [0, 0, 1, 1], [], []>} : vector<16x32xbf16>, vector<32x8xbf16>, vector<16x8xf32> -> vector<16x8xf32>
    %c0_58 = arith.constant 0 : index
    %c1_59 = arith.constant 1 : index
    %c0_60 = arith.constant 0 : index
    %c0_61 = arith.constant 0 : index
    %84 = vector.load %arg8[%c0_58, %c1_59, %c0_60, %c0_61] : memref<1x4x1x8xf32, #tpu.memory_space<vmem>>, vector<1x1x1x8xf32>
    %85 = vector.shape_cast %84 : vector<1x1x1x8xf32> to vector<1x8xf32>
    %86 = vector.broadcast %85 : vector<1x8xf32> to vector<16x8xf32>
    %87 = arith.addf %83, %86 : vector<16x8xf32>
    %88 = arith.truncf %87 : vector<16x8xf32> to vector<16x8xbf16>
    %89 = vector.shape_cast %88 : vector<16x8xbf16> to vector<2x8x8xbf16>
    %c0_62 = arith.constant 0 : index
    %c1_63 = arith.constant 1 : index
    %c0_64 = arith.constant 0 : index
    %c0_65 = arith.constant 0 : index
    %90 = vector.load %arg6[%c0_62, %c1_63, %c0_64, %c0_65] : memref<1x4x32x8xbf16, #tpu.memory_space<vmem>>, vector<1x1x32x8xbf16>
    %91 = vector.shape_cast %90 : vector<1x1x32x8xbf16> to vector<32x8xbf16>
    %cst_66 = arith.constant dense<0.000000e+00> : vector<16x8xf32>
    %92 = tpu.matmul %28, %91, %cst_66 {dimension_numbers = #tpu.dot_dimension_numbers<[1], [0], [0], [1], [0, 0, 1, 1], [], []>} : vector<16x32xbf16>, vector<32x8xbf16>, vector<16x8xf32> -> vector<16x8xf32>
    %c0_67 = arith.constant 0 : index
    %c1_68 = arith.constant 1 : index
    %c0_69 = arith.constant 0 : index
    %c0_70 = arith.constant 0 : index
    %93 = vector.load %arg9[%c0_67, %c1_68, %c0_69, %c0_70] : memref<1x4x1x8xf32, #tpu.memory_space<vmem>>, vector<1x1x1x8xf32>
    %94 = vector.shape_cast %93 : vector<1x1x1x8xf32> to vector<1x8xf32>
    %95 = vector.broadcast %94 : vector<1x8xf32> to vector<16x8xf32>
    %96 = arith.addf %92, %95 : vector<16x8xf32>
    %97 = arith.truncf %96 : vector<16x8xf32> to vector<16x8xbf16>
    %98 = vector.shape_cast %97 : vector<16x8xbf16> to vector<2x8x8xbf16>
    "tpu.trace_start"() <{level = 10 : i32, message = "bqd,bkd->bqk"}> : () -> ()
    %cst_71 = arith.constant dense<0.000000e+00> : vector<2x8x8xf32>
    %99 = tpu.matmul %80, %89, %cst_71 {dimension_numbers = #tpu.dot_dimension_numbers<[2], [2], [1], [1], [0, 0, 0, 1, 1, 1], [0], [0]>} : vector<2x8x8xbf16>, vector<2x8x8xbf16>, vector<2x8x8xf32> -> vector<2x8x8xf32>
    "tpu.trace_stop"() : () -> ()
    %cst_72 = arith.constant dense<0xFF800000> : vector<2x8xf32>
    %100 = vector.multi_reduction <maximumf>, %99, %cst_72 [2] : vector<2x8x8xf32> to vector<2x8xf32>
    %101 = vector.shape_cast %100 : vector<2x8xf32> to vector<2x8x1xf32>
    %102 = vector.broadcast %101 : vector<2x8x1xf32> to vector<2x8x8xf32>
    %103 = arith.subf %99, %102 : vector<2x8x8xf32>
    %104 = math.exp %103 : vector<2x8x8xf32>
    %cst_73 = arith.constant dense<0.000000e+00> : vector<2x8xf32>
    %105 = vector.multi_reduction <add>, %104, %cst_73 [2] : vector<2x8x8xf32> to vector<2x8xf32>
    %106 = vector.shape_cast %105 : vector<2x8xf32> to vector<2x8x1xf32>
    %107 = tpu.reciprocal %106 {approx = true} : vector<2x8x1xf32> -> vector<2x8x1xf32>
    %108 = vector.broadcast %107 : vector<2x8x1xf32> to vector<2x8x8xf32>
    %109 = arith.mulf %104, %108 : vector<2x8x8xf32>
    %110 = arith.truncf %109 : vector<2x8x8xf32> to vector<2x8x8xbf16>
    "tpu.trace_start"() <{level = 10 : i32, message = "bqk,bkd->bqd"}> : () -> ()
    %cst_74 = arith.constant dense<0.000000e+00> : vector<2x8x8xf32>
    %111 = tpu.matmul %110, %98, %cst_74 {dimension_numbers = #tpu.dot_dimension_numbers<[2], [1], [1], [2], [0, 0, 0, 1, 1, 2], [0], [0]>} : vector<2x8x8xbf16>, vector<2x8x8xbf16>, vector<2x8x8xf32> -> vector<2x8x8xf32>
    "tpu.trace_stop"() : () -> ()
    %112 = vector.shape_cast %111 : vector<2x8x8xf32> to vector<16x8xf32>
    %113 = arith.truncf %112 : vector<16x8xf32> to vector<16x8xbf16>
    %c0_75 = arith.constant 0 : index
    %c8 = arith.constant 8 : index
    %114 = vector.load %arg26[%c0_75, %c8] : memref<16x32xbf16, #tpu.memory_space<vmem>>, vector<16x8xbf16>
    tpu.vector_store %arg26[%c0_75, %c8], %113 {strides = array<i32>} : memref<16x32xbf16, #tpu.memory_space<vmem>>, vector<16x8xbf16>,
    %c0_76 = arith.constant 0 : index
    %c2 = arith.constant 2 : index
    %c0_77 = arith.constant 0 : index
    %c0_78 = arith.constant 0 : index
    %115 = vector.load %arg4[%c0_76, %c2, %c0_77, %c0_78] : memref<1x4x32x8xbf16, #tpu.memory_space<vmem>>, vector<1x1x32x8xbf16>
    %116 = vector.shape_cast %115 : vector<1x1x32x8xbf16> to vector<32x8xbf16>
    %cst_79 = arith.constant dense<0.000000e+00> : vector<16x8xf32>
    %117 = tpu.matmul %28, %116, %cst_79 {dimension_numbers = #tpu.dot_dimension_numbers<[1], [0], [0], [1], [0, 0, 1, 1], [], []>} : vector<16x32xbf16>, vector<32x8xbf16>, vector<16x8xf32> -> vector<16x8xf32>
    %c0_80 = arith.constant 0 : index
    %c2_81 = arith.constant 2 : index
    %c0_82 = arith.constant 0 : index
    %c0_83 = arith.constant 0 : index
    %118 = vector.load %arg7[%c0_80, %c2_81, %c0_82, %c0_83] : memref<1x4x1x8xf32, #tpu.memory_space<vmem>>, vector<1x1x1x8xf32>
    %119 = vector.shape_cast %118 : vector<1x1x1x8xf32> to vector<1x8xf32>
    %120 = vector.broadcast %119 : vector<1x8xf32> to vector<16x8xf32>
    %121 = arith.addf %117, %120 : vector<16x8xf32>
    %122 = arith.truncf %121 : vector<16x8xf32> to vector<16x8xbf16>
    %123 = vector.shape_cast %122 : vector<16x8xbf16> to vector<2x8x8xbf16>
    %c0_84 = arith.constant 0 : index
    %c2_85 = arith.constant 2 : index
    %c0_86 = arith.constant 0 : index
    %c0_87 = arith.constant 0 : index
    %124 = vector.load %arg5[%c0_84, %c2_85, %c0_86, %c0_87] : memref<1x4x32x8xbf16, #tpu.memory_space<vmem>>, vector<1x1x32x8xbf16>
    %125 = vector.shape_cast %124 : vector<1x1x32x8xbf16> to vector<32x8xbf16>
    %cst_88 = arith.constant dense<0.000000e+00> : vector<16x8xf32>
    %126 = tpu.matmul %28, %125, %cst_88 {dimension_numbers = #tpu.dot_dimension_numbers<[1], [0], [0], [1], [0, 0, 1, 1], [], []>} : vector<16x32xbf16>, vector<32x8xbf16>, vector<16x8xf32> -> vector<16x8xf32>
    %c0_89 = arith.constant 0 : index
    %c2_90 = arith.constant 2 : index
    %c0_91 = arith.constant 0 : index
    %c0_92 = arith.constant 0 : index
    %127 = vector.load %arg8[%c0_89, %c2_90, %c0_91, %c0_92] : memref<1x4x1x8xf32, #tpu.memory_space<vmem>>, vector<1x1x1x8xf32>
    %128 = vector.shape_cast %127 : vector<1x1x1x8xf32> to vector<1x8xf32>
    %129 = vector.broadcast %128 : vector<1x8xf32> to vector<16x8xf32>
    %130 = arith.addf %126, %129 : vector<16x8xf32>
    %131 = arith.truncf %130 : vector<16x8xf32> to vector<16x8xbf16>
    %132 = vector.shape_cast %131 : vector<16x8xbf16> to vector<2x8x8xbf16>
    %c0_93 = arith.constant 0 : index
    %c2_94 = arith.constant 2 : index
    %c0_95 = arith.constant 0 : index
    %c0_96 = arith.constant 0 : index
    %133 = vector.load %arg6[%c0_93, %c2_94, %c0_95, %c0_96] : memref<1x4x32x8xbf16, #tpu.memory_space<vmem>>, vector<1x1x32x8xbf16>
    %134 = vector.shape_cast %133 : vector<1x1x32x8xbf16> to vector<32x8xbf16>
    %cst_97 = arith.constant dense<0.000000e+00> : vector<16x8xf32>
    %135 = tpu.matmul %28, %134, %cst_97 {dimension_numbers = #tpu.dot_dimension_numbers<[1], [0], [0], [1], [0, 0, 1, 1], [], []>} : vector<16x32xbf16>, vector<32x8xbf16>, vector<16x8xf32> -> vector<16x8xf32>
    %c0_98 = arith.constant 0 : index
    %c2_99 = arith.constant 2 : index
    %c0_100 = arith.constant 0 : index
    %c0_101 = arith.constant 0 : index
    %136 = vector.load %arg9[%c0_98, %c2_99, %c0_100, %c0_101] : memref<1x4x1x8xf32, #tpu.memory_space<vmem>>, vector<1x1x1x8xf32>
    %137 = vector.shape_cast %136 : vector<1x1x1x8xf32> to vector<1x8xf32>
    %138 = vector.broadcast %137 : vector<1x8xf32> to vector<16x8xf32>
    %139 = arith.addf %135, %138 : vector<16x8xf32>
    %140 = arith.truncf %139 : vector<16x8xf32> to vector<16x8xbf16>
    %141 = vector.shape_cast %140 : vector<16x8xbf16> to vector<2x8x8xbf16>
    "tpu.trace_start"() <{level = 10 : i32, message = "bqd,bkd->bqk"}> : () -> ()
    %cst_102 = arith.constant dense<0.000000e+00> : vector<2x8x8xf32>
    %142 = tpu.matmul %123, %132, %cst_102 {dimension_numbers = #tpu.dot_dimension_numbers<[2], [2], [1], [1], [0, 0, 0, 1, 1, 1], [0], [0]>} : vector<2x8x8xbf16>, vector<2x8x8xbf16>, vector<2x8x8xf32> -> vector<2x8x8xf32>
    "tpu.trace_stop"() : () -> ()
    %cst_103 = arith.constant dense<0xFF800000> : vector<2x8xf32>
    %143 = vector.multi_reduction <maximumf>, %142, %cst_103 [2] : vector<2x8x8xf32> to vector<2x8xf32>
    %144 = vector.shape_cast %143 : vector<2x8xf32> to vector<2x8x1xf32>
    %145 = vector.broadcast %144 : vector<2x8x1xf32> to vector<2x8x8xf32>
    %146 = arith.subf %142, %145 : vector<2x8x8xf32>
    %147 = math.exp %146 : vector<2x8x8xf32>
    %cst_104 = arith.constant dense<0.000000e+00> : vector<2x8xf32>
    %148 = vector.multi_reduction <add>, %147, %cst_104 [2] : vector<2x8x8xf32> to vector<2x8xf32>
    %149 = vector.shape_cast %148 : vector<2x8xf32> to vector<2x8x1xf32>
    %150 = tpu.reciprocal %149 {approx = true} : vector<2x8x1xf32> -> vector<2x8x1xf32>
    %151 = vector.broadcast %150 : vector<2x8x1xf32> to vector<2x8x8xf32>
    %152 = arith.mulf %147, %151 : vector<2x8x8xf32>
    %153 = arith.truncf %152 : vector<2x8x8xf32> to vector<2x8x8xbf16>
    "tpu.trace_start"() <{level = 10 : i32, message = "bqk,bkd->bqd"}> : () -> ()
    %cst_105 = arith.constant dense<0.000000e+00> : vector<2x8x8xf32>
    %154 = tpu.matmul %153, %141, %cst_105 {dimension_numbers = #tpu.dot_dimension_numbers<[2], [1], [1], [2], [0, 0, 0, 1, 1, 2], [0], [0]>} : vector<2x8x8xbf16>, vector<2x8x8xbf16>, vector<2x8x8xf32> -> vector<2x8x8xf32>
    "tpu.trace_stop"() : () -> ()
    %155 = vector.shape_cast %154 : vector<2x8x8xf32> to vector<16x8xf32>
    %156 = arith.truncf %155 : vector<16x8xf32> to vector<16x8xbf16>
    %c0_106 = arith.constant 0 : index
    %c16 = arith.constant 16 : index
    %157 = vector.load %arg26[%c0_106, %c16] : memref<16x32xbf16, #tpu.memory_space<vmem>>, vector<16x8xbf16>
    tpu.vector_store %arg26[%c0_106, %c16], %156 {strides = array<i32>} : memref<16x32xbf16, #tpu.memory_space<vmem>>, vector<16x8xbf16>,
    %c0_107 = arith.constant 0 : index
    %c3 = arith.constant 3 : index
    %c0_108 = arith.constant 0 : index
    %c0_109 = arith.constant 0 : index
    %158 = vector.load %arg4[%c0_107, %c3, %c0_108, %c0_109] : memref<1x4x32x8xbf16, #tpu.memory_space<vmem>>, vector<1x1x32x8xbf16>
    %159 = vector.shape_cast %158 : vector<1x1x32x8xbf16> to vector<32x8xbf16>
    %cst_110 = arith.constant dense<0.000000e+00> : vector<16x8xf32>
    %160 = tpu.matmul %28, %159, %cst_110 {dimension_numbers = #tpu.dot_dimension_numbers<[1], [0], [0], [1], [0, 0, 1, 1], [], []>} : vector<16x32xbf16>, vector<32x8xbf16>, vector<16x8xf32> -> vector<16x8xf32>
    %c0_111 = arith.constant 0 : index
    %c3_112 = arith.constant 3 : index
    %c0_113 = arith.constant 0 : index
    %c0_114 = arith.constant 0 : index
    %161 = vector.load %arg7[%c0_111, %c3_112, %c0_113, %c0_114] : memref<1x4x1x8xf32, #tpu.memory_space<vmem>>, vector<1x1x1x8xf32>
    %162 = vector.shape_cast %161 : vector<1x1x1x8xf32> to vector<1x8xf32>
    %163 = vector.broadcast %162 : vector<1x8xf32> to vector<16x8xf32>
    %164 = arith.addf %160, %163 : vector<16x8xf32>
    %165 = arith.truncf %164 : vector<16x8xf32> to vector<16x8xbf16>
    %166 = vector.shape_cast %165 : vector<16x8xbf16> to vector<2x8x8xbf16>
    %c0_115 = arith.constant 0 : index
    %c3_116 = arith.constant 3 : index
    %c0_117 = arith.constant 0 : index
    %c0_118 = arith.constant 0 : index
    %167 = vector.load %arg5[%c0_115, %c3_116, %c0_117, %c0_118] : memref<1x4x32x8xbf16, #tpu.memory_space<vmem>>, vector<1x1x32x8xbf16>
    %168 = vector.shape_cast %167 : vector<1x1x32x8xbf16> to vector<32x8xbf16>
    %cst_119 = arith.constant dense<0.000000e+00> : vector<16x8xf32>
    %169 = tpu.matmul %28, %168, %cst_119 {dimension_numbers = #tpu.dot_dimension_numbers<[1], [0], [0], [1], [0, 0, 1, 1], [], []>} : vector<16x32xbf16>, vector<32x8xbf16>, vector<16x8xf32> -> vector<16x8xf32>
    %c0_120 = arith.constant 0 : index
    %c3_121 = arith.constant 3 : index
    %c0_122 = arith.constant 0 : index
    %c0_123 = arith.constant 0 : index
    %170 = vector.load %arg8[%c0_120, %c3_121, %c0_122, %c0_123] : memref<1x4x1x8xf32, #tpu.memory_space<vmem>>, vector<1x1x1x8xf32>
    %171 = vector.shape_cast %170 : vector<1x1x1x8xf32> to vector<1x8xf32>
    %172 = vector.broadcast %171 : vector<1x8xf32> to vector<16x8xf32>
    %173 = arith.addf %169, %172 : vector<16x8xf32>
    %174 = arith.truncf %173 : vector<16x8xf32> to vector<16x8xbf16>
    %175 = vector.shape_cast %174 : vector<16x8xbf16> to vector<2x8x8xbf16>
    %c0_124 = arith.constant 0 : index
    %c3_125 = arith.constant 3 : index
    %c0_126 = arith.constant 0 : index
    %c0_127 = arith.constant 0 : index
    %176 = vector.load %arg6[%c0_124, %c3_125, %c0_126, %c0_127] : memref<1x4x32x8xbf16, #tpu.memory_space<vmem>>, vector<1x1x32x8xbf16>
    %177 = vector.shape_cast %176 : vector<1x1x32x8xbf16> to vector<32x8xbf16>
    %cst_128 = arith.constant dense<0.000000e+00> : vector<16x8xf32>
    %178 = tpu.matmul %28, %177, %cst_128 {dimension_numbers = #tpu.dot_dimension_numbers<[1], [0], [0], [1], [0, 0, 1, 1], [], []>} : vector<16x32xbf16>, vector<32x8xbf16>, vector<16x8xf32> -> vector<16x8xf32>
    %c0_129 = arith.constant 0 : index
    %c3_130 = arith.constant 3 : index
    %c0_131 = arith.constant 0 : index
    %c0_132 = arith.constant 0 : index
    %179 = vector.load %arg9[%c0_129, %c3_130, %c0_131, %c0_132] : memref<1x4x1x8xf32, #tpu.memory_space<vmem>>, vector<1x1x1x8xf32>
    %180 = vector.shape_cast %179 : vector<1x1x1x8xf32> to vector<1x8xf32>
    %181 = vector.broadcast %180 : vector<1x8xf32> to vector<16x8xf32>
    %182 = arith.addf %178, %181 : vector<16x8xf32>
    %183 = arith.truncf %182 : vector<16x8xf32> to vector<16x8xbf16>
    %184 = vector.shape_cast %183 : vector<16x8xbf16> to vector<2x8x8xbf16>
    "tpu.trace_start"() <{level = 10 : i32, message = "bqd,bkd->bqk"}> : () -> ()
    %cst_133 = arith.constant dense<0.000000e+00> : vector<2x8x8xf32>
    %185 = tpu.matmul %166, %175, %cst_133 {dimension_numbers = #tpu.dot_dimension_numbers<[2], [2], [1], [1], [0, 0, 0, 1, 1, 1], [0], [0]>} : vector<2x8x8xbf16>, vector<2x8x8xbf16>, vector<2x8x8xf32> -> vector<2x8x8xf32>
    "tpu.trace_stop"() : () -> ()
    %cst_134 = arith.constant dense<0xFF800000> : vector<2x8xf32>
    %186 = vector.multi_reduction <maximumf>, %185, %cst_134 [2] : vector<2x8x8xf32> to vector<2x8xf32>
    %187 = vector.shape_cast %186 : vector<2x8xf32> to vector<2x8x1xf32>
    %188 = vector.broadcast %187 : vector<2x8x1xf32> to vector<2x8x8xf32>
    %189 = arith.subf %185, %188 : vector<2x8x8xf32>
    %190 = math.exp %189 : vector<2x8x8xf32>
    %cst_135 = arith.constant dense<0.000000e+00> : vector<2x8xf32>
    %191 = vector.multi_reduction <add>, %190, %cst_135 [2] : vector<2x8x8xf32> to vector<2x8xf32>
    %192 = vector.shape_cast %191 : vector<2x8xf32> to vector<2x8x1xf32>
    %193 = tpu.reciprocal %192 {approx = true} : vector<2x8x1xf32> -> vector<2x8x1xf32>
    %194 = vector.broadcast %193 : vector<2x8x1xf32> to vector<2x8x8xf32>
    %195 = arith.mulf %190, %194 : vector<2x8x8xf32>
    %196 = arith.truncf %195 : vector<2x8x8xf32> to vector<2x8x8xbf16>
    "tpu.trace_start"() <{level = 10 : i32, message = "bqk,bkd->bqd"}> : () -> ()
    %cst_136 = arith.constant dense<0.000000e+00> : vector<2x8x8xf32>
    %197 = tpu.matmul %196, %184, %cst_136 {dimension_numbers = #tpu.dot_dimension_numbers<[2], [1], [1], [2], [0, 0, 0, 1, 1, 2], [0], [0]>} : vector<2x8x8xbf16>, vector<2x8x8xbf16>, vector<2x8x8xf32> -> vector<2x8x8xf32>
    "tpu.trace_stop"() : () -> ()
    %198 = vector.shape_cast %197 : vector<2x8x8xf32> to vector<16x8xf32>
    %199 = arith.truncf %198 : vector<16x8xf32> to vector<16x8xbf16>
    %c0_137 = arith.constant 0 : index
    %c24 = arith.constant 24 : index
    %200 = vector.load %arg26[%c0_137, %c24] : memref<16x32xbf16, #tpu.memory_space<vmem>>, vector<16x8xbf16>
    tpu.vector_store %arg26[%c0_137, %c24], %199 {strides = array<i32>} : memref<16x32xbf16, #tpu.memory_space<vmem>>, vector<16x8xbf16>,
    %c0_138 = arith.constant 0 : index
    %c0_139 = arith.constant 0 : index
    %201 = vector.load %arg26[%c0_138, %c0_139] : memref<16x32xbf16, #tpu.memory_space<vmem>>, vector<16x32xbf16>
    %c0_140 = arith.constant 0 : index
    %c0_141 = arith.constant 0 : index
    %c0_142 = arith.constant 0 : index
    %202 = vector.load %arg10[%c0_140, %c0_141, %c0_142] : memref<1x32x32xbf16, #tpu.memory_space<vmem>>, vector<1x32x32xbf16>
    %203 = vector.shape_cast %202 : vector<1x32x32xbf16> to vector<32x32xbf16>
    %cst_143 = arith.constant dense<0.000000e+00> : vector<16x32xf32>
    %204 = tpu.matmul %201, %203, %cst_143 {dimension_numbers = #tpu.dot_dimension_numbers<[1], [0], [0], [1], [0, 0, 1, 1], [], []>} : vector<16x32xbf16>, vector<32x32xbf16>, vector<16x32xf32> -> vector<16x32xf32>
    %c0_144 = arith.constant 0 : index
    %c0_145 = arith.constant 0 : index
    %c0_146 = arith.constant 0 : index
    %205 = vector.load %arg11[%c0_144, %c0_145, %c0_146] : memref<1x1x32xf32, #tpu.memory_space<vmem>>, vector<1x1x32xf32>
    %206 = vector.shape_cast %205 : vector<1x1x32xf32> to vector<1x32xf32>
    %207 = vector.broadcast %206 : vector<1x32xf32> to vector<16x32xf32>
    %208 = arith.addf %204, %207 : vector<16x32xf32>
    %c0_147 = arith.constant 0 : index
    %c0_148 = arith.constant 0 : index
    %c0_149 = arith.constant 0 : index
    %209 = vector.load %arg12[%c0_147, %c0_148, %c0_149] : memref<1x32x32xbf16, #tpu.memory_space<vmem>>, vector<1x32x32xbf16>
    %210 = vector.shape_cast %209 : vector<1x32x32xbf16> to vector<32x32xbf16>
    %cst_150 = arith.constant dense<0.000000e+00> : vector<16x32xf32>
    %211 = tpu.matmul %28, %210, %cst_150 {dimension_numbers = #tpu.dot_dimension_numbers<[1], [0], [0], [1], [0, 0, 1, 1], [], []>} : vector<16x32xbf16>, vector<32x32xbf16>, vector<16x32xf32> -> vector<16x32xf32>
    %212 = arith.truncf %208 : vector<16x32xf32> to vector<16x32xbf16>
    %c0_151 = arith.constant 0 : index
    %c0_152 = arith.constant 0 : index
    %c0_153 = arith.constant 0 : index
    %213 = vector.load %arg13[%c0_151, %c0_152, %c0_153] : memref<1x32x32xbf16, #tpu.memory_space<vmem>>, vector<1x32x32xbf16>
    %214 = vector.shape_cast %213 : vector<1x32x32xbf16> to vector<32x32xbf16>
    %cst_154 = arith.constant dense<0.000000e+00> : vector<16x32xf32>
    %215 = tpu.matmul %212, %214, %cst_154 {dimension_numbers = #tpu.dot_dimension_numbers<[1], [0], [0], [1], [0, 0, 1, 1], [], []>} : vector<16x32xbf16>, vector<32x32xbf16>, vector<16x32xf32> -> vector<16x32xf32>
    %216 = arith.addf %211, %215 : vector<16x32xf32>
    %c0_155 = arith.constant 0 : index
    %c0_156 = arith.constant 0 : index
    %c0_157 = arith.constant 0 : index
    %217 = vector.load %arg14[%c0_155, %c0_156, %c0_157] : memref<1x1x32xf32, #tpu.memory_space<vmem>>, vector<1x1x32xf32>
    %218 = vector.shape_cast %217 : vector<1x1x32xf32> to vector<1x32xf32>
    %219 = vector.broadcast %218 : vector<1x32xf32> to vector<16x32xf32>
    %220 = arith.addf %216, %219 : vector<16x32xf32>
    %221 = arith.negf %220 : vector<16x32xf32>
    %222 = math.exp %221 : vector<16x32xf32>
    %cst_158 = arith.constant 1.000000e+00 : f32
    %223 = vector.broadcast %cst_158 : f32 to vector<16x32xf32>
    %224 = arith.addf %223, %222 : vector<16x32xf32>
    %225 = arith.divf %223, %224 : vector<16x32xf32>
    %226 = arith.mulf %225, %208 : vector<16x32xf32>
    %227 = arith.addf %27, %226 : vector<16x32xf32>
    %cst_159 = arith.constant dense<0.000000e+00> : vector<16xf32>
    %228 = vector.multi_reduction <add>, %227, %cst_159 [1] : vector<16x32xf32> to vector<16xf32>
    %229 = vector.shape_cast %228 : vector<16xf32> to vector<16x1xf32>
    %cst_160 = arith.constant 3.200000e+01 : f32
    %230 = vector.broadcast %cst_160 : f32 to vector<16x1xf32>
    %231 = arith.divf %229, %230 : vector<16x1xf32>
    %232 = vector.broadcast %231 : vector<16x1xf32> to vector<16x32xf32>
    %233 = arith.subf %227, %232 : vector<16x32xf32>
    %234 = arith.mulf %233, %233 : vector<16x32xf32>
    %cst_161 = arith.constant dense<0.000000e+00> : vector<16xf32>
    %235 = vector.multi_reduction <add>, %234, %cst_161 [1] : vector<16x32xf32> to vector<16xf32>
    %236 = vector.shape_cast %235 : vector<16xf32> to vector<16x1xf32>
    %cst_162 = arith.constant 3.200000e+01 : f32
    %237 = vector.broadcast %cst_162 : f32 to vector<16x1xf32>
    %238 = arith.divf %236, %237 : vector<16x1xf32>
    %cst_163 = arith.constant 9.99999974E-6 : f32
    %239 = vector.broadcast %cst_163 : f32 to vector<16x1xf32>
    %240 = arith.addf %238, %239 : vector<16x1xf32>
    %241 = math.rsqrt %240 : vector<16x1xf32>
    %242 = vector.broadcast %241 : vector<16x1xf32> to vector<16x32xf32>
    %243 = arith.mulf %233, %242 : vector<16x32xf32>
    %c0_164 = arith.constant 0 : index
    %c0_165 = arith.constant 0 : index
    %c0_166 = arith.constant 0 : index
    %244 = vector.load %arg15[%c0_164, %c0_165, %c0_166] : memref<1x1x32xf32, #tpu.memory_space<vmem>>, vector<1x1x32xf32>
    %245 = vector.shape_cast %244 : vector<1x1x32xf32> to vector<1x32xf32>
    %246 = vector.broadcast %245 : vector<1x32xf32> to vector<16x32xf32>
    %247 = arith.mulf %243, %246 : vector<16x32xf32>
    %c0_167 = arith.constant 0 : index
    %c0_168 = arith.constant 0 : index
    %c0_169 = arith.constant 0 : index
    %248 = vector.load %arg16[%c0_167, %c0_168, %c0_169] : memref<1x1x32xf32, #tpu.memory_space<vmem>>, vector<1x1x32xf32>
    %249 = vector.shape_cast %248 : vector<1x1x32xf32> to vector<1x32xf32>
    %250 = vector.broadcast %249 : vector<1x32xf32> to vector<16x32xf32>
    %251 = arith.addf %247, %250 : vector<16x32xf32>
    %252 = arith.addf %3, %251 : vector<16x32xf32>
    %cst_170 = arith.constant dense<0.000000e+00> : vector<16xf32>
    %253 = vector.multi_reduction <add>, %252, %cst_170 [1] : vector<16x32xf32> to vector<16xf32>
    %254 = vector.shape_cast %253 : vector<16xf32> to vector<16x1xf32>
    %cst_171 = arith.constant 3.200000e+01 : f32
    %255 = vector.broadcast %cst_171 : f32 to vector<16x1xf32>
    %256 = arith.divf %254, %255 : vector<16x1xf32>
    %257 = vector.broadcast %256 : vector<16x1xf32> to vector<16x32xf32>
    %258 = arith.subf %252, %257 : vector<16x32xf32>
    %259 = arith.mulf %258, %258 : vector<16x32xf32>
    %cst_172 = arith.constant dense<0.000000e+00> : vector<16xf32>
    %260 = vector.multi_reduction <add>, %259, %cst_172 [1] : vector<16x32xf32> to vector<16xf32>
    %261 = vector.shape_cast %260 : vector<16xf32> to vector<16x1xf32>
    %cst_173 = arith.constant 3.200000e+01 : f32
    %262 = vector.broadcast %cst_173 : f32 to vector<16x1xf32>
    %263 = arith.divf %261, %262 : vector<16x1xf32>
    %cst_174 = arith.constant 9.99999974E-6 : f32
    %264 = vector.broadcast %cst_174 : f32 to vector<16x1xf32>
    %265 = arith.addf %263, %264 : vector<16x1xf32>
    %266 = math.rsqrt %265 : vector<16x1xf32>
    %267 = vector.broadcast %266 : vector<16x1xf32> to vector<16x32xf32>
    %268 = arith.mulf %258, %267 : vector<16x32xf32>
    %c0_175 = arith.constant 0 : index
    %c0_176 = arith.constant 0 : index
    %c0_177 = arith.constant 0 : index
    %269 = vector.load %arg17[%c0_175, %c0_176, %c0_177] : memref<1x1x32xf32, #tpu.memory_space<vmem>>, vector<1x1x32xf32>
    %270 = vector.shape_cast %269 : vector<1x1x32xf32> to vector<1x32xf32>
    %271 = vector.broadcast %270 : vector<1x32xf32> to vector<16x32xf32>
    %272 = arith.mulf %268, %271 : vector<16x32xf32>
    %c0_178 = arith.constant 0 : index
    %c0_179 = arith.constant 0 : index
    %c0_180 = arith.constant 0 : index
    %273 = vector.load %arg18[%c0_178, %c0_179, %c0_180] : memref<1x1x32xf32, #tpu.memory_space<vmem>>, vector<1x1x32xf32>
    %274 = vector.shape_cast %273 : vector<1x1x32xf32> to vector<1x32xf32>
    %275 = vector.broadcast %274 : vector<1x32xf32> to vector<16x32xf32>
    %276 = arith.addf %272, %275 : vector<16x32xf32>
    %277 = arith.truncf %276 : vector<16x32xf32> to vector<16x32xbf16>
    %c0_181 = arith.constant 0 : index
    %c0_182 = arith.constant 0 : index
    %c0_183 = arith.constant 0 : index
    %278 = vector.load %arg19[%c0_181, %c0_182, %c0_183] : memref<1x32x64xbf16, #tpu.memory_space<vmem>>, vector<1x32x64xbf16>
    %279 = vector.shape_cast %278 : vector<1x32x64xbf16> to vector<32x64xbf16>
    %cst_184 = arith.constant dense<0.000000e+00> : vector<16x64xf32>
    %280 = tpu.matmul %277, %279, %cst_184 {dimension_numbers = #tpu.dot_dimension_numbers<[1], [0], [0], [1], [0, 0, 1, 1], [], []>} : vector<16x32xbf16>, vector<32x64xbf16>, vector<16x64xf32> -> vector<16x64xf32>
    %c0_185 = arith.constant 0 : index
    %c0_186 = arith.constant 0 : index
    %c0_187 = arith.constant 0 : index
    %281 = vector.load %arg20[%c0_185, %c0_186, %c0_187] : memref<1x1x64xf32, #tpu.memory_space<vmem>>, vector<1x1x64xf32>
    %282 = vector.shape_cast %281 : vector<1x1x64xf32> to vector<1x64xf32>
    %283 = vector.broadcast %282 : vector<1x64xf32> to vector<16x64xf32>
    %284 = arith.addf %280, %283 : vector<16x64xf32>
    %cst_188 = arith.constant 5.000000e-01 : f32
    %285 = vector.broadcast %cst_188 : f32 to vector<16x64xf32>
    %286 = arith.mulf %285, %284 : vector<16x64xf32>
    %cst_189 = arith.constant 0.707106769 : f32
    %287 = vector.broadcast %cst_189 : f32 to vector<16x64xf32>
    %288 = arith.mulf %284, %287 : vector<16x64xf32>
    %289 = math.erf %288 : vector<16x64xf32>
    %cst_190 = arith.constant 1.000000e+00 : f32
    %290 = vector.broadcast %cst_190 : f32 to vector<16x64xf32>
    %291 = arith.addf %290, %289 : vector<16x64xf32>
    %292 = arith.mulf %286, %291 : vector<16x64xf32>
    %293 = arith.truncf %292 : vector<16x64xf32> to vector<16x64xbf16>
    %c0_191 = arith.constant 0 : index
    %c0_192 = arith.constant 0 : index
    %c0_193 = arith.constant 0 : index
    %294 = vector.load %arg21[%c0_191, %c0_192, %c0_193] : memref<1x64x32xbf16, #tpu.memory_space<vmem>>, vector<1x64x32xbf16>
    %295 = vector.shape_cast %294 : vector<1x64x32xbf16> to vector<64x32xbf16>
    %cst_194 = arith.constant dense<0.000000e+00> : vector<16x32xf32>
    %296 = tpu.matmul %293, %295, %cst_194 {dimension_numbers = #tpu.dot_dimension_numbers<[1], [0], [0], [1], [0, 0, 1, 1], [], []>} : vector<16x64xbf16>, vector<64x32xbf16>, vector<16x32xf32> -> vector<16x32xf32>
    %297 = arith.addf %252, %296 : vector<16x32xf32>
    %c0_195 = arith.constant 0 : index
    %c0_196 = arith.constant 0 : index
    %c0_197 = arith.constant 0 : index
    %298 = vector.load %arg22[%c0_195, %c0_196, %c0_197] : memref<1x1x32xf32, #tpu.memory_space<vmem>>, vector<1x1x32xf32>
    %299 = vector.shape_cast %298 : vector<1x1x32xf32> to vector<1x32xf32>
    %300 = vector.broadcast %299 : vector<1x32xf32> to vector<16x32xf32>
    %301 = arith.addf %297, %300 : vector<16x32xf32>
    %c0_198 = arith.constant 0 : index
    %c0_199 = arith.constant 0 : index
    %302 = vector.load %arg25[%c0_198, %c0_199] : memref<16x32xf32, #tpu.memory_space<vmem>>, vector<16x32xf32>
    tpu.vector_store %arg25[%c0_198, %c0_199], %301 {strides = array<i32>} : memref<16x32xf32, #tpu.memory_space<vmem>>, vector<16x32xf32>,
    %c3_i32 = arith.constant 3 : i32
    %303 = arith.cmpi eq, %arg0, %c3_i32 : i32
    %304 = arith.extui %303 : i1 to i32
    %c0_i32_200 = arith.constant 0 : i32
    %305 = arith.cmpi ne, %304, %c0_i32_200 : i32
    scf.if %305 {
      %c0_201 = arith.constant 0 : index
      %c0_202 = arith.constant 0 : index
      %306 = vector.load %arg23[%c0_201, %c0_202] : memref<1x32xf32, #tpu.memory_space<vmem>>, vector<1x32xf32>
      %307 = vector.broadcast %306 : vector<1x32xf32> to vector<16x32xf32>
      %308 = arith.addf %301, %307 : vector<16x32xf32>
      %c0_203 = arith.constant 0 : index
      %c0_204 = arith.constant 0 : index
      %309 = vector.load %arg24[%c0_203, %c0_204] : memref<16x32xf32, #tpu.memory_space<vmem>>, vector<16x32xf32>
      tpu.vector_store %arg24[%c0_203, %c0_204], %308 {strides = array<i32>} : memref<16x32xf32, #tpu.memory_space<vmem>>, vector<16x32xf32>,
    } else {
    }
    return
  }
  func.func @transform_0(%arg0: i32) -> (i32, i32) {
    %c0_i32 = arith.constant 0 : i32
    %c0_i32_0 = arith.constant 0 : i32
    %c0_i32_1 = arith.constant 0 : i32
    return %c0_i32, %c0_i32_0 : i32, i32
  }
  func.func @transform_1(%arg0: i32) -> (i32, i32, i32) {
    %c0_i32 = arith.constant 0 : i32
    %c0_i32_0 = arith.constant 0 : i32
    %c0_i32_1 = arith.constant 0 : i32
    return %arg0, %c0_i32, %c0_i32_0 : i32, i32, i32
  }
  func.func @transform_2(%arg0: i32) -> (i32, i32, i32) {
    %c0_i32 = arith.constant 0 : i32
    %c0_i32_0 = arith.constant 0 : i32
    %c0_i32_1 = arith.constant 0 : i32
    return %arg0, %c0_i32, %c0_i32_0 : i32, i32, i32
  }
  func.func @transform_3(%arg0: i32) -> (i32, i32, i32, i32) {
    %c0_i32 = arith.constant 0 : i32
    %c0_i32_0 = arith.constant 0 : i32
    %c0_i32_1 = arith.constant 0 : i32
    %c0_i32_2 = arith.constant 0 : i32
    return %arg0, %c0_i32, %c0_i32_0, %c0_i32_1 : i32, i32, i32, i32
  }
  func.func @transform_4(%arg0: i32) -> (i32, i32, i32, i32) {
    %c0_i32 = arith.constant 0 : i32
    %c0_i32_0 = arith.constant 0 : i32
    %c0_i32_1 = arith.constant 0 : i32
    %c0_i32_2 = arith.constant 0 : i32
    return %arg0, %c0_i32, %c0_i32_0, %c0_i32_1 : i32, i32, i32, i32
  }
  func.func @transform_5(%arg0: i32) -> (i32, i32, i32, i32) {
    %c0_i32 = arith.constant 0 : i32
    %c0_i32_0 = arith.constant 0 : i32
    %c0_i32_1 = arith.constant 0 : i32
    %c0_i32_2 = arith.constant 0 : i32
    return %arg0, %c0_i32, %c0_i32_0, %c0_i32_1 : i32, i32, i32, i32
  }
  func.func @transform_6(%arg0: i32) -> (i32, i32, i32, i32) {
    %c0_i32 = arith.constant 0 : i32
    %c0_i32_0 = arith.constant 0 : i32
    %c0_i32_1 = arith.constant 0 : i32
    %c0_i32_2 = arith.constant 0 : i32
    return %arg0, %c0_i32, %c0_i32_0, %c0_i32_1 : i32, i32, i32, i32
  }
  func.func @transform_7(%arg0: i32) -> (i32, i32, i32, i32) {
    %c0_i32 = arith.constant 0 : i32
    %c0_i32_0 = arith.constant 0 : i32
    %c0_i32_1 = arith.constant 0 : i32
    %c0_i32_2 = arith.constant 0 : i32
    return %arg0, %c0_i32, %c0_i32_0, %c0_i32_1 : i32, i32, i32, i32
  }
  func.func @transform_8(%arg0: i32) -> (i32, i32, i32, i32) {
    %c0_i32 = arith.constant 0 : i32
    %c0_i32_0 = arith.constant 0 : i32
    %c0_i32_1 = arith.constant 0 : i32
    %c0_i32_2 = arith.constant 0 : i32
    return %arg0, %c0_i32, %c0_i32_0, %c0_i32_1 : i32, i32, i32, i32
  }
  func.func @transform_9(%arg0: i32) -> (i32, i32, i32) {
    %c0_i32 = arith.constant 0 : i32
    %c0_i32_0 = arith.constant 0 : i32
    %c0_i32_1 = arith.constant 0 : i32
    return %arg0, %c0_i32, %c0_i32_0 : i32, i32, i32
  }
  func.func @transform_10(%arg0: i32) -> (i32, i32, i32) {
    %c0_i32 = arith.constant 0 : i32
    %c0_i32_0 = arith.constant 0 : i32
    %c0_i32_1 = arith.constant 0 : i32
    return %arg0, %c0_i32, %c0_i32_0 : i32, i32, i32
  }
  func.func @transform_11(%arg0: i32) -> (i32, i32, i32) {
    %c0_i32 = arith.constant 0 : i32
    %c0_i32_0 = arith.constant 0 : i32
    %c0_i32_1 = arith.constant 0 : i32
    return %arg0, %c0_i32, %c0_i32_0 : i32, i32, i32
  }
  func.func @transform_12(%arg0: i32) -> (i32, i32, i32) {
    %c0_i32 = arith.constant 0 : i32
    %c0_i32_0 = arith.constant 0 : i32
    %c0_i32_1 = arith.constant 0 : i32
    return %arg0, %c0_i32, %c0_i32_0 : i32, i32, i32
  }
  func.func @transform_13(%arg0: i32) -> (i32, i32, i32) {
    %c0_i32 = arith.constant 0 : i32
    %c0_i32_0 = arith.constant 0 : i32
    %c0_i32_1 = arith.constant 0 : i32
    return %arg0, %c0_i32, %c0_i32_0 : i32, i32, i32
  }
  func.func @transform_14(%arg0: i32) -> (i32, i32, i32) {
    %c0_i32 = arith.constant 0 : i32
    %c0_i32_0 = arith.constant 0 : i32
    %c0_i32_1 = arith.constant 0 : i32
    return %arg0, %c0_i32, %c0_i32_0 : i32, i32, i32
  }
  func.func @transform_15(%arg0: i32) -> (i32, i32, i32) {
    %c0_i32 = arith.constant 0 : i32
    %c0_i32_0 = arith.constant 0 : i32
    %c0_i32_1 = arith.constant 0 : i32
    return %arg0, %c0_i32, %c0_i32_0 : i32, i32, i32
  }
  func.func @transform_16(%arg0: i32) -> (i32, i32, i32) {
    %c0_i32 = arith.constant 0 : i32
    %c0_i32_0 = arith.constant 0 : i32
    %c0_i32_1 = arith.constant 0 : i32
    return %arg0, %c0_i32, %c0_i32_0 : i32, i32, i32
  }
  func.func @transform_17(%arg0: i32) -> (i32, i32, i32) {
    %c0_i32 = arith.constant 0 : i32
    %c0_i32_0 = arith.constant 0 : i32
    %c0_i32_1 = arith.constant 0 : i32
    return %arg0, %c0_i32, %c0_i32_0 : i32, i32, i32
  }
  func.func @transform_18(%arg0: i32) -> (i32, i32, i32) {
    %c0_i32 = arith.constant 0 : i32
    %c0_i32_0 = arith.constant 0 : i32
    %c0_i32_1 = arith.constant 0 : i32
    return %arg0, %c0_i32, %c0_i32_0 : i32, i32, i32
  }
  func.func @transform_19(%arg0: i32) -> (i32, i32, i32) {
    %c0_i32 = arith.constant 0 : i32
    %c0_i32_0 = arith.constant 0 : i32
    %c0_i32_1 = arith.constant 0 : i32
    return %arg0, %c0_i32, %c0_i32_0 : i32, i32, i32
  }
  func.func @transform_20(%arg0: i32) -> (i32, i32, i32) {
    %c0_i32 = arith.constant 0 : i32
    %c0_i32_0 = arith.constant 0 : i32
    %c0_i32_1 = arith.constant 0 : i32
    return %arg0, %c0_i32, %c0_i32_0 : i32, i32, i32
  }
  func.func @transform_21(%arg0: i32) -> (i32, i32, i32) {
    %c0_i32 = arith.constant 0 : i32
    %c0_i32_0 = arith.constant 0 : i32
    %c0_i32_1 = arith.constant 0 : i32
    return %arg0, %c0_i32, %c0_i32_0 : i32, i32, i32
  }
  func.func @transform_22(%arg0: i32) -> (i32, i32) {
    %c0_i32 = arith.constant 0 : i32
    %c0_i32_0 = arith.constant 0 : i32
    %c0_i32_1 = arith.constant 0 : i32
    return %c0_i32, %c0_i32_0 : i32, i32
  }
  func.func @transform_23(%arg0: i32) -> (i32, i32) {
    %c0_i32 = arith.constant 0 : i32
    %c0_i32_0 = arith.constant 0 : i32
    %c0_i32_1 = arith.constant 0 : i32
    return %c0_i32, %c0_i32_0 : i32, i32
  }
}

</mosaic_0001>

<bundles_post_ra>
// kernel: expert_forward.1
= control target key start
LH: loop header
LB: loop body
LE: loop exit
PB: predicated region body
PF: predicated region fallthrough
CT: control target
= control target key end

     0   :  { %s4915_s0 = inlined_call_operand.vmem [shape: f32[16,32], index: 0, kind: input, shape index: {}]   ;;  %s4916_s1 = inlined_call_operand.vmem [shape: f32[4,1,32], index: 1, kind: input, shape index: {}]   ;;  %s4917_s2 = inlined_call_operand.vmem [shape: f32[4,1,32], index: 2, kind: input, shape index: {}]   ;;  %s4918_s3 = inlined_call_operand.vmem [shape: bf16[4,4,32,8], index: 3, kind: input, shape index: {}]   ;;  %s4919_s4 = inlined_call_operand.vmem [shape: bf16[4,4,32,8], index: 4, kind: input, shape index: {}]   ;;  %s4920_s5 = inlined_call_operand.vmem [shape: bf16[4,4,32,8], index: 5, kind: input, shape index: {}]   ;;  %s4921_s6 = inlined_call_operand.vmem [shape: f32[4,4,1,8], index: 6, kind: input, shape index: {}]   ;;  %s4922_s7 = inlined_call_operand.vmem [shape: f32[4,4,1,8], index: 7, kind: input, shape index: {}]   ;;  %s4923_s8 = inlined_call_operand.vmem [shape: f32[4,4,1,8], index: 8, kind: input, shape index: {}]   ;;  %s4924_s9 = inlined_call_operand.vmem [shape: bf16[4,32,32], index: 9, kind: input, shape index: {}]   ;;  %s4925_s10 = inlined_call_operand.vmem [shape: f32[4,1,32], index: 10, kind: input, shape index: {}]   ;;  %s4926_s11 = inlined_call_operand.vmem [shape: bf16[4,32,32], index: 11, kind: input, shape index: {}]   ;;  %s4927_s12 = inlined_call_operand.vmem [shape: bf16[4,32,32], index: 12, kind: input, shape index: {}]   ;;  %s4928_s13 = inlined_call_operand.vmem [shape: f32[4,1,32], index: 13, kind: input, shape index: {}]   ;;  %s4929_s14 = inlined_call_operand.vmem [shape: f32[4,1,32], index: 14, kind: input, shape index: {}]   ;;  %s4930_s15 = inlined_call_operand.vmem [shape: f32[4,1,32], index: 15, kind: input, shape index: {}]   ;;  %s4931_s16 = inlined_call_operand.vmem [shape: f32[4,1,32], index: 16, kind: input, shape index: {}]   ;;  %s4932_s17 = inlined_call_operand.vmem [shape: f32[4,1,32], index: 17, kind: input, shape index: {}]   ;;  %s4933_s18 = inlined_call_operand.vmem [shape: bf16[4,32,64], index: 18, kind: input, shape index: {}]   ;;  %s4934_s19 = inlined_call_operand.vmem [shape: f32[4,1,64], index: 19, kind: input, shape index: {}]   ;;  %s4935_s20 = inlined_call_operand.vmem [shape: bf16[4,64,32], index: 20, kind: input, shape index: {}]   ;;  %s4936_s21 = inlined_call_operand.vmem [shape: f32[4,1,32], index: 21, kind: input, shape index: {}]   ;;  %s4937_s22 = inlined_call_operand.vmem [shape: f32[1,32], index: 22, kind: input, shape index: {}]   ;;  %s4938_s23 = inlined_call_operand.hbm [shape: f32[16,32], index: 23, kind: output, shape index: {}]  }
   0x1   :  { %4947 = sst [smem:[#allocation13_spill]] %s4915_s0 }
   0x2   :  { %4948 = sst [smem:[#allocation14_spill]] %s4916_s1 }
   0x3   :  { %4949 = sst [smem:[#allocation15_spill]] %s4917_s2 }
   0x4   :  { %4950 = sst [smem:[#allocation16_spill]] %s4918_s3 }
   0x5   :  { %4951 = sst [smem:[#allocation17_spill]] %s4919_s4 }
   0x6   :  { %4952 = sst [smem:[#allocation18_spill]] %s4920_s5 }
   0x7   :  { %4953 = sst [smem:[#allocation19_spill]] %s4921_s6 }
   0x8   :  { %4954 = sst [smem:[#allocation20_spill]] %s4922_s7 }
   0x9   :  { %4955 = sst [smem:[#allocation21_spill]] %s4923_s8 }
   0xa   :  { %4956 = sst [smem:[#allocation22_spill]] %s4924_s9 }
   0xb   :  { %4957 = sst [smem:[#allocation23_spill]] %s4925_s10 }
   0xc   :  { %4958 = sst [smem:[#allocation24_spill]] %s4926_s11 }
   0xd   :  { %4959 = sst [smem:[#allocation25_spill]] %s4927_s12 }
   0xe   :  { %4960 = sst [smem:[#allocation26_spill]] %s4931_s16 }
   0xf   :  { %4961 = sst [smem:[#allocation27_spill]] %s4935_s20 }
  0x10   :  { %4962 = sst [smem:[#allocation28_spill]] %s4936_s21 }
  0x11   :  { %4963 = sst [smem:[#allocation29_spill]] %s4937_s22 }
  0x12   :  { %4964 = sst [smem:[#allocation30_spill]] %s4938_s23 }
  0x13   :  { %28 = vsyncpa [#allocation5], 0  ;;  %s4428_s4 = smov 0  }
  0x14 LB: > { %4965 = sst [smem:[#allocation7_spill]] %s4299_s4  ;;  %s4434_s30 = sadd.s32 4294967295, %s4299_s4   ;;  %s4299_s4 = sphi %s4428_s4, %s34_s4  }
  0x15   : > { %4966 = sst [smem:[#allocation8_spill]] %s4434_s30  ;;  %p3590_p0 = scmp.ge.s32.totalorder %s4299_s4, 1 }
  0x16   : > { %p810_p1 = scmp.lt.s32.totalorder %s4299_s4, 5 }
  0x18   : > { %p811_p2 = pnand %p3590_p0, %p810_p1 }
  0x1a   : > { %814 = sbr.rel (%p811_p2) target bundleno = 5107 (0x13f3), region = 112 }
  0x1f   : > { %p946_p3 = scmp.lt.s32.totalorder %s4434_s30, 3  ;;  %s4969_s4 = sld [smem:[#allocation16_spill]] }
  0x20   : > { %s4971_s22 = sld [smem:[#allocation17_spill]] }
  0x21   : > { %s4440_s24 = scalar_select %p946_p3, %s4434_s30, 3 }
  0x22   : > { %s4972_s2 = sld [smem:[#allocation18_spill]] }
  0x23   : > { %s3788_s28 = sshll.u32 %s4440_s24, 6  ;;  %s3597_s29 = sshll.u32 %s4440_s24, 2 }
  0x24   : > { %s4973_s20 = sld [smem:[#allocation19_spill]]  ;;  %s3791_s26 = sshll.u32 %s4440_s24, 4 }
  0x25   : > { %s4455_s25 = scalar_lea.vmem %s4969_s4, %s3788_s28  ;;  %s4975_s0 = sld [smem:[#allocation20_spill]] }
  0x26   : > { %4970 = sst [smem:[#allocation9_spill]] %s4455_s25  ;;  %s4460_s30 = scalar_lea.vmem %s4971_s22, %s3788_s28 }
  0x27   : > { %s4977_s8 = sld [smem:[#allocation21_spill]]  ;;  %s4525_s22 = scalar_lea.vmem %s4933_s18, %s3791_s26 }
  0x28   : > { %s4465_s6 = scalar_lea.vmem %s4972_s2, %s3788_s28  ;;  %s4979_s9 = sld [smem:[#allocation22_spill]] }
  0x29   : > { %s4980_s11 = sld [smem:[#allocation24_spill]]  ;;  %s1019_s1 = scalar_lea.vmem %s4934_s19, %s4440_s24 }
  0x2a   : > { %s4470_s21 = scalar_lea.vmem %s4973_s20, %s3597_s29  ;;  %s4981_s12 = sld [smem:[#allocation25_spill]] }
  0x2b   : > { %4974 = sst [smem:[#allocation10_spill]] %s4470_s21  ;;  %s4475_s25 = scalar_lea.vmem %s4975_s0, %s3597_s29 }
  0x2c   : > { %4976 = sst [smem:[#allocation11_spill]] %s4475_s25  ;;  %s1011_s0 = scalar_lea.vmem %s4932_s17, %s4440_s24 }
  0x2d   : > { %s4480_s5 = scalar_lea.vmem %s4977_s8, %s3597_s29  ;;  %s3795_s7 = sshll.u32 %s4440_s24, 5 }
  0x2e   : > { %s4490_s20 = scalar_lea.vmem %s4979_s9, %s3791_s26  ;;  %s4984_s9 = sld [smem:[#allocation28_spill]] }
  0x2f   : > { %s4495_s4 = scalar_lea.vmem %s4980_s11, %s3791_s26  ;;  %s4985_s11 = sld [smem:[#allocation27_spill]] }
  0x30   : > { %s4500_s29 = scalar_lea.vmem %s4981_s12, %s3791_s26  ;;  %s4986_s10 = sld [smem:[#allocation8_spill]] }
  0x31   : > { %4982 = sst [smem:[#allocation12_spill]] %s4500_s29 }
  0x34   : > { %s1027_s28 = scalar_lea.vmem %s4984_s9, %s4440_s24 }
  0x35   : > { %s4539_s16 = scalar_lea.vmem %s4985_s11, %s3795_s7 }
  0x36   : > { %p3610_p4 = scmp.ne.s32.totalorder %s4986_s10, 0 }
  0x37   : > { %s4987_s29 = sld [smem:[#allocation13_spill]] (!%p3610_p4) }
  0x38   : > { %1032 = sbr.rel (%p3610_p4) target bundleno = 63 (0x3f), region = 116 }
  0x3d   : > { %v1033_v0 = vld [vmem:[%s4987_s29] sm:$0xff]  ;;  %vm1035_vm0 = vcmask 261120   ;;  %v1034_v1 = vld [vmem:[%s4987_s29 + $0x8] sm:$0xff] }
  0x3e   : > { %1036 = vst.msk [vmem:[#allocation2] sm:$0xff] %vm1035_vm0, %v1033_v0  ;;  %1037 = vst.msk [vmem:[#allocation2 + $0x8] sm:$0xff] %vm1035_vm0, %v1034_v1 }
  0x3f PF: > { %vm1040_vm1 = vcmask 261120   ;;  %s4988_s9 = sld [smem:[#allocation9_spill]]  ;;  %v4171_v17 = vld [vmem:[%s4465_s6 + $0x8] sm:$0xff]   ;;  %v4301_v18 = vmov 0.0   ;;  %v4173_v20 = vld [vmem:[%s4465_s6] sm:$0xff]   ;;  %vm4302_vm2 = vmmov 0   ;;  %s4999_s21 = scalar_lea.vmem %s4929_s14, %s4440_s24 }
  0x40   : > { %3913 = vmatprep.subr.bf16.mxu1 %v4301_v18  ;;  %3929 = vmatprep.subr.bf16.mxu0 %v4301_v18  ;;  %s4989_s2 = sld [smem:[#allocation14_spill]]  ;;  %v4174_v37 = vld [vmem:[%s4460_s30 + $0x8] sm:$0xff]   ;;  %v4175_v39 = vld [vmem:[%s4460_s30] sm:$0xff]   ;;  %vm1300_vm3 = vcmask 64512   ;;  %vm1420_vm4 = vcmask 1043456   ;;  %vm1518_vm5 = vcmask 60416  }
  0x41   : > { %3930 = vmatpush3.bf16.msra.mxu0 %v4171_v17  ;;  %3917 = vmatprep.mubr.msk.bf16.mxu1 %vm4302_vm2, %v4301_v18  ;;  %s4991_s3 = sld [smem:[#allocation15_spill]]  ;;  %v3625_v51 = vld [vmem:[%s4480_s5] ss:$0 sm:$0xff]  ;;  %vm1957_vm6 = vcmask 126016   ;;  %vm2396_vm7 = vcmask 191616   ;;  %vm2835_vm8 = vcmask 257216  }
  0x42   : > { %3931 = vmatprep.subr.bf16.mxu0 %v4301_v18  ;;  %3933 = vmatprep.mubr.msk.bf16.mxu0 %vm4302_vm2, %v4301_v18  ;;  %s4993_s12 = sld [smem:[#allocation11_spill]]  ;;  %vm3256_vm9 = vcmask 523264  }
  0x43   : > { %s4994_s26 = sld [smem:[#allocation10_spill]] }
  0x44   : > { %s4996_s23 = sld [smem:[#allocation23_spill]] }
  0x45   : > { %v1038_v2 = vld [vmem:[#allocation2] sm:$0xff]  ;;  %v1039_v3 = vld [vmem:[#allocation2 + $0x8] sm:$0xff]  ;;  %3932 = vmatpush3.bf16.msra.mxu0 %v4173_v20 }
  0x46   : > { %v1041_v4 = vsel %vm1040_vm1, %v1038_v2, 0.0  ;;  %v1044_v5 = vsel %vm1040_vm1, %v1039_v3, 0.0  ;;  %v4170_v16 = vld [vmem:[%s4988_s9 + $0x8] sm:$0xff]   ;;  %v4172_v19 = vld [vmem:[%s4988_s9] sm:$0xff]   ;;  %3943 = vmatprep.subr.bf16.mxu0 %v4301_v18  ;;  %s4990_s8 = scalar_lea.vmem %s4989_s2, %s4440_s24  ;;  %s4998_s2 = scalar_lea.vmem %s4928_s13, %s4440_s24 }
  0x47   : > { %1042 = vadd.xlane.f32.xlu0 %v1041_v4  ;;  %3914 = vmatpush3.bf16.msra.mxu1 %v4170_v16  ;;  %v3611_v29 = vld [vmem:[%s4990_s8] ss:$0 sm:$0xff]  ;;  %s4992_s10 = scalar_lea.vmem %s4991_s3, %s4440_s24 }
  0x48   : > { %3915 = vmatprep.subr.bf16.mxu1 %v4301_v18  ;;  %v3612_v33 = vld [vmem:[%s4992_s10] ss:$0 sm:$0xff] }
  0x49   : > { %v3619_v48 = vld [vmem:[%s4993_s12] ss:$0 sm:$0xff] }
  0x4a   : > { %v3613_v54 = vld [vmem:[%s4994_s26] ss:$0 sm:$0xff] }
  0x4b   : > { %1045 = vadd.xlane.f32.xlu0 %v1044_v5  ;;  %3916 = vmatpush3.bf16.msra.mxu1 %v4172_v19 }
  0x4c   : > { %3921 = vmatprep.subr.bf16.mxu1 %v4301_v18 }
  0xd0   : > { %v1043_v6 = vpop.xlane.xlu0 %1042 }
  0xd1   : > { %v1048_v7 = vmul.f32 0.03125, %v1043_v6 }
  0xd3   : > { %v1050_v8 = vsub.f32 %v1038_v2, %v1048_v7 }
  0xd4   : > { %v1046_v9 = vpop.xlane.xlu0 %1045 }
  0xd5   : > { %v1049_v10 = vmul.f32 0.03125, %v1046_v9  ;;  %v1052_v11 = vmul.f32 %v1050_v8, %v1050_v8 }
  0xd7   : > { %v1051_v12 = vsub.f32 %v1039_v3, %v1049_v10  ;;  %v1054_v13 = vsel %vm1040_vm1, %v1052_v11, 0.0 }
  0xd8   : > { %1055 = vadd.xlane.f32.xlu1 %v1054_v13 }
  0xd9   : > { %v1053_v14 = vmul.f32 %v1051_v12, %v1051_v12 }
  0xdb   : > { %v1057_v15 = vsel %vm1040_vm1, %v1053_v14, 0.0 }
  0xdc   : > { %1058 = vadd.xlane.f32.xlu1 %v1057_v15 }
 0x161   : > { %v1056_v21 = vpop.xlane.xlu1 %1055 }
 0x162   : > { %v1060_v22 = vmul.f32 0.03125, %v1056_v21 }
 0x164   : > { %v1062_v23 = vadd.f32 1e-05, %v1060_v22 }
 0x165   : > { %v1059_v24 = vpop.xlane.xlu1 %1058 }
 0x166   : > { %4207 = vrsqrt.f32 %v1062_v23  ;;  %v1061_v25 = vmul.f32 0.03125, %v1059_v24 }
 0x168   : > { %v1063_v26 = vadd.f32 1e-05, %v1061_v25 }
 0x16a   : > { %4209 = vrsqrt.f32 %v1063_v26 }
 0x173   : > { %v4208_v27 = vpop.eup %4207 }
 0x174   : > { %v1066_v28 = vmul.f32 %v4208_v27, %v1050_v8 }
 0x176   : > { %v1075_v31 = vmul.f32 %v3611_v29, %v1066_v28 }
 0x177   : > { %v4210_v30 = vpop.eup %4209 }
 0x178   : > { %v1067_v32 = vmul.f32 %v4210_v30, %v1051_v12  ;;  %v4576_v35 = vadd.f32 %v3612_v33, %v1075_v31 }
 0x17a   : > { %v1076_v34 = vmul.f32 %v3611_v29, %v1067_v32  ;;  %v4176_v32 = vld [vmem:[%s4988_s9 + $0x18] sm:$0xff]  }
 0x17c   : > { %v4578_v36 = vadd.f32 %v3612_v33, %v1076_v34 }
 0x17e   : > { %v4583_v38 = vpack.c.bf16 %v4578_v36, %v4576_v35 }
 0x180   : > { %3918 = vmatmul.mubr.msk.bf16.vlgmr.msra.gmra.mxu1 %vm1040_vm1, %v4583_v38  ;;  %3934 = vmatmul.mubr.msk.bf16.vlgmr.msra.gmra.mxu0 %vm1040_vm1, %v4583_v38 }
 0x181   : > { %3922 = vmatpush3.bf16.msra.mxu1 %v4174_v37  ;;  %3925 = vmatprep.mubr.msk.bf16.mxu1 %vm4302_vm2, %v4301_v18 }
 0x182   : > { %3923 = vmatprep.subr.bf16.mxu1 %v4301_v18  ;;  %3945 = vmatprep.mubr.msk.bf16.mxu0 %vm4302_vm2, %v4301_v18 }
 0x185   : > { %3924 = vmatpush3.bf16.msra.mxu1 %v4175_v39  ;;  %v4177_v39 = vld [vmem:[%s4988_s9 + $0x10] sm:$0xff]  }
 0x186   : > { %3937 = vmatprep.subr.bf16.mxu1 %v4301_v18 }
 0x188   : > { %3926 = vmatmul.mubr.msk.bf16.vlgmr.msra.gmra.mxu1 %vm1040_vm1, %v4583_v38 }
 0x189   : > { %3939 = vmatprep.mubr.msk.bf16.mxu1 %vm4302_vm2, %v4301_v18 }
 0x240   : > { %v1147_v40 = vpop.f32.mrf.mxu1  ;;  %v1287_v41 = vpop.f32.mrf.mxu0 }
 0x241   : > { %v1288_v56 = vadd.f32 %v3625_v51, %v1287_v41  ;;  %v1148_v60 = vadd.f32 %v3613_v54, %v1147_v40  ;;  %v4178_v40 = vld [vmem:[%s4460_s30 + $0x18] sm:$0xff]  }
 0x242   : > { %v3919_v42 = vpop.f32.mrf.mxu1  ;;  %v3935_v43 = vpop.f32.mrf.mxu0 }
 0x243   : > { %v3800_v62 = vpack.c.bf16 %v1288_v56, %v1288_v56  ;;  %v3796_v1 = vpack.c.bf16 %v1148_v60, %v1148_v60  ;;  %v4179_v42 = vld [vmem:[%s4460_s30 + $0x10] sm:$0xff]   ;;  %v4180_v43 = vld [vmem:[%s4465_s6 + $0x18] sm:$0xff]  }
 0x244   : > { %v1150_v44 = vpop.f32.mrf.mxu1  ;;  %v1290_v45 = vpop.f32.mrf.mxu0 }
 0x245   : > { %v1291_v63 = vadd.f32 %v3625_v51, %v1290_v45  ;;  %v1151_v2 = vadd.f32 %v3613_v54, %v1150_v44  ;;  %v1422_v3 = vsel %vm1420_vm4, %v3800_v62, 0  ;;  %v4181_v44 = vld [vmem:[%s4465_s6 + $0x10] sm:$0xff]  }
 0x246   : > { %v3920_v46 = vpop.f32.mrf.mxu1  ;;  %v3936_v47 = vpop.f32.mrf.mxu0 }
 0x247   : > { %v3801_v4 = vpack.c.bf16 %v1291_v63, %v1291_v63  ;;  %v3797_v5 = vpack.c.bf16 %v1151_v2, %v1151_v2  ;;  %v3664_v63 = vld [vmem:[%s4480_s5 + $0x1] ss:$0 sm:$0xff] }
 0x248   : > { %v1217_v49 = vpop.f32.mrf.mxu1 }
 0x249   : > { %v1218_v50 = vadd.f32 %v3619_v48, %v1217_v49  ;;  %v1468_v6 = vsel %vm1420_vm4, %v3801_v4, 0 }
 0x24a   : > { %v3927_v52 = vpop.f32.mrf.mxu1 }
 0x24b   : > { %v3798_v53 = vpack.c.bf16 %v1218_v50, %v1218_v50 }
 0x24c   : > { %v1220_v55 = vpop.f32.mrf.mxu1 }
 0x24d   : > { %v1305_v57 = vsel %vm1300_vm3, %v3798_v53, 0  ;;  %v1221_v58 = vadd.f32 %v3619_v48, %v1220_v55 }
 0x24e   : > { %v3928_v59 = vpop.f32.mrf.mxu1  ;;  %3938 = vmatpush3.bf16.xpose.msra.mxu1 %v1305_v57  ;;  %v3653_v57 = vld [vmem:[%s4993_s12 + $0x1] ss:$0 sm:$0xff] }
 0x24f   : > { %v3799_v61 = vpack.c.bf16 %v1221_v58, %v1221_v58  ;;  %3949 = vmatprep.subr.bf16.mxu1 %v4301_v18 }
 0x251   : > { %v1351_v0 = vsel %vm1300_vm3, %v3799_v61, 0 }
 0x252   : > { %3944 = vmatpush3.bf16.xpose.msra.mxu0 %v1351_v0 }
 0x253   : > { %3955 = vmatprep.subr.bf16.mxu0 %v4301_v18 }
 0x255   : > { %3940 = vmatmul.mubr.msk.bf16.vlgmr.msra.gmra.mxu1 %vm1300_vm3, %v3796_v1  ;;  %v3642_v1 = vld [vmem:[%s4994_s26 + $0x1] ss:$0 sm:$0xff] }
 0x256   : > { %3950 = vmatpush3.bf16.msra.mxu1 %v1422_v3  ;;  %3951 = vmatprep.mubr.msk.bf16.mxu1 %vm4302_vm2, %v4301_v18 }
 0x257   : > { %3961 = vmatprep.subr.bf16.mxu1 %v4301_v18 }
 0x259   : > { %3946 = vmatmul.mubr.msk.bf16.vlgmr.msra.gmra.mxu0 %vm1300_vm3, %v3797_v5 }
 0x25a   : > { %3956 = vmatpush3.bf16.msra.mxu0 %v1468_v6  ;;  %3957 = vmatprep.mubr.msk.bf16.mxu0 %vm4302_vm2, %v4301_v18 }
 0x25b   : > { %3969 = vmatprep.subr.bf16.mxu0 %v4301_v18 }
 0x315   : > { %v1341_v7 = vpop.f32.mrf.mxu1 }
 0x316   : > { %v1393_v8 = vsel %vm1300_vm3, %v1341_v7, -inf }
 0x317   : > { %1394 = vmax.xlane.f32.xlu1 %v1393_v8  ;;  %v3941_v9 = vpop.f32.mrf.mxu1 }
 0x319   : > { %v1344_v10 = vpop.f32.mrf.mxu1  ;;  %v1387_v11 = vpop.f32.mrf.mxu0 }
 0x31a   : > { %v1396_v12 = vsel %vm1300_vm3, %v1387_v11, -inf }
 0x31b   : > { %1397 = vmax.xlane.f32.xlu0 %v1396_v12  ;;  %v3942_v13 = vpop.f32.mrf.mxu1  ;;  %v3947_v14 = vpop.f32.mrf.mxu0 }
 0x31d   : > { %v1390_v15 = vpop.f32.mrf.mxu0 }
 0x31f   : > { %v3948_v16 = vpop.f32.mrf.mxu0 }
 0x3a0   : > { %v1395_v17 = vpop.xlane.xlu1 %1394 }
 0x3a1   : > { %v1399_v19 = vsub.f32 %v1341_v7, %v1395_v17 }
 0x3a3   : > { %v1401_v20 = vmul.f32 1.442695, %v1399_v19 }
 0x3a4   : > { %v1398_v21 = vpop.xlane.xlu0 %1397 }
 0x3a5   : > { %4211 = vpow2.f32 %v1401_v20  ;;  %v1400_v22 = vsub.f32 %v1387_v11, %v1398_v21 }
 0x3a7   : > { %v1403_v23 = vmul.f32 1.442695, %v1400_v22 }
 0x3a9   : > { %4213 = vpow2.f32 %v1403_v23 }
 0x3b2   : > { %v4212_v24 = vpop.eup %4211 }
 0x3b3   : > { %v1405_v25 = vsel %vm1300_vm3, %v4212_v24, 0.0 }
 0x3b4   : > { %1406 = vadd.xlane.f32.xlu1 %v1405_v25 }
 0x3b6   : > { %v4214_v26 = vpop.eup %4213 }
 0x3b7   : > { %v1408_v27 = vsel %vm1300_vm3, %v4214_v26, 0.0 }
 0x3b8   : > { %1409 = vadd.xlane.f32.xlu0 %v1408_v27 }
 0x43d   : > { %v1407_v28 = vpop.xlane.xlu1 %1406 }
 0x43e   : > { %4215 = vrcp.f32 %v1407_v28 }
 0x441   : > { %v1410_v29 = vpop.xlane.xlu0 %1409 }
 0x442   : > { %4217 = vrcp.f32 %v1410_v29 }
 0x44b   : > { %v4216_v30 = vpop.eup %4215 }
 0x44c   : > { %v1413_v31 = vmul.f32 %v4216_v30, %v4212_v24 }
 0x44e   : > { %v1415_v33 = vpack.c.bf16 %v1413_v31, %v1413_v31 }
 0x44f   : > { %v4218_v34 = vpop.eup %4217 }
 0x450   : > { %3952 = vmatmul.mubr.msk.bf16.vlgmr.msra.gmra.mxu1 %vm1300_vm3, %v1415_v33  ;;  %v1414_v37 = vmul.f32 %v4218_v34, %v4214_v26 }
 0x451   : > { %3962 = vmatpush3.bf16.msra.mxu1 %v4176_v32  ;;  %3965 = vmatprep.mubr.msk.bf16.mxu1 %vm4302_vm2, %v4301_v18 }
 0x452   : > { %v1416_v41 = vpack.c.bf16 %v1414_v37, %v1414_v37  ;;  %3963 = vmatprep.subr.bf16.mxu1 %v4301_v18 }
 0x454   : > { %3958 = vmatmul.mubr.msk.bf16.vlgmr.msra.gmra.mxu0 %vm1300_vm3, %v1416_v41 }
 0x455   : > { %3964 = vmatpush3.bf16.msra.mxu1 %v4177_v39  ;;  %3970 = vmatpush3.bf16.msra.mxu0 %v4178_v40 }
 0x456   : > { %3971 = vmatprep.subr.bf16.mxu0 %v4301_v18  ;;  %3977 = vmatprep.subr.bf16.mxu1 %v4301_v18 }
 0x457   : > { %3973 = vmatprep.mubr.msk.bf16.mxu0 %vm4302_vm2, %v4301_v18 }
 0x458   : > { %3966 = vmatmul.mubr.msk.bf16.vlgmr.msra.gmra.mxu1 %vm1040_vm1, %v4583_v38 }
 0x459   : > { %3972 = vmatpush3.bf16.msra.mxu0 %v4179_v42  ;;  %3978 = vmatpush3.bf16.msra.mxu1 %v4180_v43 }
 0x45a   : > { %3979 = vmatprep.subr.bf16.mxu1 %v4301_v18  ;;  %3981 = vmatprep.mubr.msk.bf16.mxu1 %vm4302_vm2, %v4301_v18 }
 0x45b   : > { %3985 = vmatprep.subr.bf16.mxu0 %v4301_v18 }
 0x45c   : > { %3974 = vmatmul.mubr.msk.bf16.vlgmr.msra.gmra.mxu0 %vm1040_vm1, %v4583_v38 }
 0x45d   : > { %3980 = vmatpush3.bf16.msra.mxu1 %v4181_v44  ;;  %3987 = vmatprep.mubr.msk.bf16.mxu0 %vm4302_vm2, %v4301_v18 }
 0x45e   : > { %3991 = vmatprep.subr.bf16.mxu1 %v4301_v18 }
 0x460   : > { %3982 = vmatmul.mubr.msk.bf16.vlgmr.msra.gmra.mxu1 %vm1040_vm1, %v4583_v38 }
 0x461   : > { %3993 = vmatprep.mubr.msk.bf16.mxu1 %vm4302_vm2, %v4301_v18 }
 0x510   : > { %v1458_v45 = vpop.f32.mrf.mxu1 }
 0x511   : > { %v3802_v46 = vpack.c.bf16 %v1458_v45, %v1458_v45 }
 0x512   : > { %v3953_v47 = vpop.f32.mrf.mxu1 }
 0x513   : > { %1519 = vst.msk [vmem:[#allocation3] sm:$0xf] %vm1518_vm5, %v3802_v46 }
 0x514   : > { %v1461_v48 = vpop.f32.mrf.mxu1  ;;  %v1504_v49 = vpop.f32.mrf.mxu0 }
 0x515   : > { %v3803_v50 = vpack.c.bf16 %v1504_v49, %v1504_v49 }
 0x516   : > { %v3954_v51 = vpop.f32.mrf.mxu1  ;;  %v3959_v52 = vpop.f32.mrf.mxu0 }
 0x517   : > { %1520 = vst.msk [vmem:[#allocation3 + $0x4] sm:$0xf] %vm1518_vm5, %v3803_v50  ;;  %v4182_v50 = vld [vmem:[%s4988_s9 + $0x28] sm:$0xff]  }
 0x518   : > { %v1507_v53 = vpop.f32.mrf.mxu0  ;;  %v1580_v54 = vpop.f32.mrf.mxu1 }
 0x519   : > { %v1581_v9 = vadd.f32 %v3642_v1, %v1580_v54  ;;  %v4183_v54 = vld [vmem:[%s4988_s9 + $0x20] sm:$0xff]  }
 0x51a   : > { %v3960_v55 = vpop.f32.mrf.mxu0  ;;  %v3967_v56 = vpop.f32.mrf.mxu1 }
 0x51b   : > { %v3804_v16 = vpack.c.bf16 %v1581_v9, %v1581_v9  ;;  %v4184_v55 = vld [vmem:[%s4460_s30 + $0x28] sm:$0xff]  }
 0x51c   : > { %v1583_v58 = vpop.f32.mrf.mxu1  ;;  %v1652_v59 = vpop.f32.mrf.mxu0 }
 0x51d   : > { %v1653_v60 = vadd.f32 %v3653_v57, %v1652_v59  ;;  %v1584_v17 = vadd.f32 %v3642_v1, %v1583_v58  ;;  %v4186_v58 = vld [vmem:[%s4465_s6 + $0x28] sm:$0xff]   ;;  %v4187_v59 = vld [vmem:[%s4465_s6 + $0x20] sm:$0xff]  }
 0x51e   : > { %v3968_v61 = vpop.f32.mrf.mxu1  ;;  %v3975_v62 = vpop.f32.mrf.mxu0 }
 0x51f   : > { %v3806_v0 = vpack.c.bf16 %v1653_v60, %v1653_v60  ;;  %v3805_v21 = vpack.c.bf16 %v1584_v17, %v1584_v17 }
 0x520   : > { %v1655_v2 = vpop.f32.mrf.mxu0  ;;  %v1724_v3 = vpop.f32.mrf.mxu1 }
 0x521   : > { %v1741_v4 = vsel %vm1300_vm3, %v3806_v0, 0  ;;  %v1656_v5 = vadd.f32 %v3653_v57, %v1655_v2  ;;  %v1725_v6 = vadd.f32 %v3664_v63, %v1724_v3  ;;  %v4185_v57 = vld [vmem:[%s4460_s30 + $0x20] sm:$0xff]  }
 0x522   : > { %v3976_v7 = vpop.f32.mrf.mxu0  ;;  %v3983_v8 = vpop.f32.mrf.mxu1  ;;  %3986 = vmatpush3.bf16.xpose.msra.mxu0 %v1741_v4 }
 0x523   : > { %v3807_v10 = vpack.c.bf16 %v1656_v5, %v1656_v5  ;;  %3997 = vmatprep.subr.bf16.mxu0 %v4301_v18  ;;  %v3808_v13 = vpack.c.bf16 %v1725_v6, %v1725_v6  ;;  %v3692_v6 = vld [vmem:[%s4993_s12 + $0x2] ss:$0 sm:$0xff] }
 0x524   : > { %v1727_v11 = vpop.f32.mrf.mxu1 }
 0x525   : > { %v1787_v12 = vsel %vm1300_vm3, %v3807_v10, 0  ;;  %v1728_v14 = vadd.f32 %v3664_v63, %v1727_v11  ;;  %v1857_v19 = vsel %vm1420_vm4, %v3808_v13, 0 }
 0x526   : > { %v3984_v15 = vpop.f32.mrf.mxu1  ;;  %3992 = vmatpush3.bf16.xpose.msra.mxu1 %v1787_v12  ;;  %v3703_v12 = vld [vmem:[%s4480_s5 + $0x2] ss:$0 sm:$0xff] }
 0x527   : > { %4003 = vmatprep.subr.bf16.mxu1 %v4301_v18  ;;  %v3809_v20 = vpack.c.bf16 %v1728_v14, %v1728_v14  ;;  %v3681_v14 = vld [vmem:[%s4994_s26 + $0x2] ss:$0 sm:$0xff] }
 0x529   : > { %3988 = vmatmul.mubr.msk.bf16.vlgmr.msra.gmra.mxu0 %vm1300_vm3, %v3804_v16  ;;  %v1903_v22 = vsel %vm1420_vm4, %v3809_v20, 0 }
 0x52a   : > { %3998 = vmatpush3.bf16.msra.mxu0 %v1857_v19  ;;  %3999 = vmatprep.mubr.msk.bf16.mxu0 %vm4302_vm2, %v4301_v18 }
 0x52b   : > { %4009 = vmatprep.subr.bf16.mxu0 %v4301_v18 }
 0x52d   : > { %3994 = vmatmul.mubr.msk.bf16.vlgmr.msra.gmra.mxu1 %vm1300_vm3, %v3805_v21 }
 0x52e   : > { %4004 = vmatpush3.bf16.msra.mxu1 %v1903_v22  ;;  %4005 = vmatprep.mubr.msk.bf16.mxu1 %vm4302_vm2, %v4301_v18 }
 0x52f   : > { %4017 = vmatprep.subr.bf16.mxu1 %v4301_v18 }
 0x5e9   : > { %v1777_v23 = vpop.f32.mrf.mxu0 }
 0x5ea   : > { %v1829_v24 = vsel %vm1300_vm3, %v1777_v23, -inf }
 0x5eb   : > { %1830 = vmax.xlane.f32.xlu1 %v1829_v24  ;;  %v3989_v25 = vpop.f32.mrf.mxu0 }
 0x5ed   : > { %v1780_v26 = vpop.f32.mrf.mxu0  ;;  %v1823_v27 = vpop.f32.mrf.mxu1 }
 0x5ee   : > { %v1832_v28 = vsel %vm1300_vm3, %v1823_v27, -inf }
 0x5ef   : > { %v3990_v29 = vpop.f32.mrf.mxu0  ;;  %1833 = vmax.xlane.f32.xlu0 %v1832_v28  ;;  %v3995_v30 = vpop.f32.mrf.mxu1 }
 0x5f1   : > { %v1826_v31 = vpop.f32.mrf.mxu1 }
 0x5f3   : > { %v3996_v32 = vpop.f32.mrf.mxu1 }
 0x674   : > { %v1831_v33 = vpop.xlane.xlu1 %1830 }
 0x675   : > { %v1835_v34 = vsub.f32 %v1777_v23, %v1831_v33 }
 0x677   : > { %v1837_v37 = vmul.f32 1.442695, %v1835_v34 }
 0x678   : > { %v1834_v39 = vpop.xlane.xlu0 %1833 }
 0x679   : > { %4219 = vpow2.f32 %v1837_v37  ;;  %v1836_v40 = vsub.f32 %v1823_v27, %v1834_v39 }
 0x67b   : > { %v1839_v41 = vmul.f32 1.442695, %v1836_v40 }
 0x67d   : > { %4221 = vpow2.f32 %v1839_v41 }
 0x686   : > { %v4220_v42 = vpop.eup %4219 }
 0x687   : > { %v1841_v43 = vsel %vm1300_vm3, %v4220_v42, 0.0 }
 0x688   : > { %1842 = vadd.xlane.f32.xlu1 %v1841_v43 }
 0x68a   : > { %v4222_v44 = vpop.eup %4221 }
 0x68b   : > { %v1844_v45 = vsel %vm1300_vm3, %v4222_v44, 0.0 }
 0x68c   : > { %1845 = vadd.xlane.f32.xlu0 %v1844_v45 }
 0x711   : > { %v1843_v46 = vpop.xlane.xlu1 %1842 }
 0x712   : > { %4223 = vrcp.f32 %v1843_v46 }
 0x715   : > { %v1846_v47 = vpop.xlane.xlu0 %1845 }
 0x716   : > { %4225 = vrcp.f32 %v1846_v47 }
 0x71f   : > { %v4224_v48 = vpop.eup %4223 }
 0x720   : > { %v1849_v49 = vmul.f32 %v4224_v48, %v4220_v42 }
 0x722   : > { %v1851_v51 = vpack.c.bf16 %v1849_v49, %v1849_v49 }
 0x723   : > { %v4226_v52 = vpop.eup %4225 }
 0x724   : > { %4000 = vmatmul.mubr.msk.bf16.vlgmr.msra.gmra.mxu0 %vm1300_vm3, %v1851_v51  ;;  %v1850_v53 = vmul.f32 %v4226_v52, %v4222_v44 }
 0x725   : > { %4010 = vmatpush3.bf16.msra.mxu0 %v4182_v50  ;;  %4013 = vmatprep.mubr.msk.bf16.mxu0 %vm4302_vm2, %v4301_v18 }
 0x726   : > { %v1852_v56 = vpack.c.bf16 %v1850_v53, %v1850_v53  ;;  %4011 = vmatprep.subr.bf16.mxu0 %v4301_v18 }
 0x728   : > { %4006 = vmatmul.mubr.msk.bf16.vlgmr.msra.gmra.mxu1 %vm1300_vm3, %v1852_v56 }
 0x729   : > { %4012 = vmatpush3.bf16.msra.mxu0 %v4183_v54  ;;  %4018 = vmatpush3.bf16.msra.mxu1 %v4184_v55 }
 0x72a   : > { %4019 = vmatprep.subr.bf16.mxu1 %v4301_v18  ;;  %4025 = vmatprep.subr.bf16.mxu0 %v4301_v18 }
 0x72b   : > { %4021 = vmatprep.mubr.msk.bf16.mxu1 %vm4302_vm2, %v4301_v18 }
 0x72c   : > { %4014 = vmatmul.mubr.msk.bf16.vlgmr.msra.gmra.mxu0 %vm1040_vm1, %v4583_v38 }
 0x72d   : > { %4020 = vmatpush3.bf16.msra.mxu1 %v4185_v57  ;;  %4026 = vmatpush3.bf16.msra.mxu0 %v4186_v58 }
 0x72e   : > { %4027 = vmatprep.subr.bf16.mxu0 %v4301_v18  ;;  %4029 = vmatprep.mubr.msk.bf16.mxu0 %vm4302_vm2, %v4301_v18 }
 0x72f   : > { %4033 = vmatprep.subr.bf16.mxu1 %v4301_v18 }
 0x730   : > { %4022 = vmatmul.mubr.msk.bf16.vlgmr.msra.gmra.mxu1 %vm1040_vm1, %v4583_v38 }
 0x731   : > { %4028 = vmatpush3.bf16.msra.mxu0 %v4187_v59  ;;  %4035 = vmatprep.mubr.msk.bf16.mxu1 %vm4302_vm2, %v4301_v18 }
 0x732   : > { %4039 = vmatprep.subr.bf16.mxu0 %v4301_v18 }
 0x734   : > { %4030 = vmatmul.mubr.msk.bf16.vlgmr.msra.gmra.mxu0 %vm1040_vm1, %v4583_v38 }
 0x735   : > { %4041 = vmatprep.mubr.msk.bf16.mxu0 %vm4302_vm2, %v4301_v18 }
 0x7e4   : > { %v4702_v60 = vpop.f32.mrf.mxu0 }
 0x7e6   : > { %v4001_v61 = vpop.f32.mrf.mxu0 }
 0x7e8   : > { %v1896_v62 = vpop.f32.mrf.mxu0  ;;  %v4704_v63 = vpop.f32.mrf.mxu1 }
 0x7ea   : > { %v4002_v0 = vpop.f32.mrf.mxu0  ;;  %v4007_v1 = vpop.f32.mrf.mxu1 }
 0x7eb   : > { %v4188_v1 = vld [vmem:[%s4988_s9 + $0x38] sm:$0xff]  }
 0x7ec   : > { %v1942_v2 = vpop.f32.mrf.mxu1  ;;  %v2019_v3 = vpop.f32.mrf.mxu0 }
 0x7ed   : > { %v2020_v23 = vadd.f32 %v3681_v14, %v2019_v3 }
 0x7ee   : > { %v4008_v4 = vpop.f32.mrf.mxu1  ;;  %v4015_v5 = vpop.f32.mrf.mxu0 }
 0x7ef   : > { %v3812_v30 = vpack.c.bf16 %v2020_v23, %v2020_v23  ;;  %v4189_v5 = vld [vmem:[%s4988_s9 + $0x30] sm:$0xff]   ;;  %s4997_s9 = scalar_lea.vmem %s4996_s23, %s4440_s24 }
 0x7f0   : > { %v2022_v7 = vpop.f32.mrf.mxu0  ;;  %v2091_v8 = vpop.f32.mrf.mxu1 }
 0x7f1   : > { %v2092_v9 = vadd.f32 %v3692_v6, %v2091_v8  ;;  %v2023_v31 = vadd.f32 %v3681_v14, %v2022_v7  ;;  %v4191_v8 = vld [vmem:[%s4460_s30 + $0x30] sm:$0xff]  }
 0x7f2   : > { %v4016_v10 = vpop.f32.mrf.mxu0  ;;  %v4023_v11 = vpop.f32.mrf.mxu1 }
 0x7f3   : > { %v3814_v13 = vpack.c.bf16 %v2092_v9, %v2092_v9  ;;  %v3813_v34 = vpack.c.bf16 %v2023_v31, %v2023_v31  ;;  %v4192_v9 = vld [vmem:[%s4465_s6 + $0x38] sm:$0xff]   ;;  %v4193_v10 = vld [vmem:[%s4465_s6 + $0x30] sm:$0xff]   ;;  %s4304_s6 = smov 16  }
 0x7f4   : > { %v2094_v15 = vpop.f32.mrf.mxu1  ;;  %v2163_v16 = vpop.f32.mrf.mxu0 }
 0x7f5   : > { %v2180_v17 = vsel %vm1300_vm3, %v3814_v13, 0  ;;  %v2095_v19 = vadd.f32 %v3692_v6, %v2094_v15  ;;  %v2164_v20 = vadd.f32 %v3703_v12, %v2163_v16  ;;  %v4190_v6 = vld [vmem:[%s4460_s30 + $0x38] sm:$0xff]   ;;  %s4303_s30 = smov 8  }
 0x7f6   : > { %v4024_v21 = vpop.f32.mrf.mxu1  ;;  %v4031_v22 = vpop.f32.mrf.mxu0  ;;  %4034 = vmatpush3.bf16.xpose.msra.mxu1 %v2180_v17 }
 0x7f7   : > { %v3815_v24 = vpack.c.bf16 %v2095_v19, %v2095_v19  ;;  %4045 = vmatprep.subr.bf16.mxu1 %v4301_v18  ;;  %v3816_v27 = vpack.c.bf16 %v2164_v20, %v2164_v20  ;;  %v3731_v22 = vld [vmem:[%s4993_s12 + $0x3] ss:$0 sm:$0xff]  ;;  %s5000_s12 = scalar_lea.vmem %s4930_s15, %s4440_s24 }
 0x7f8   : > { %v2166_v25 = vpop.f32.mrf.mxu0 }
 0x7f9   : > { %v2226_v26 = vsel %vm1300_vm3, %v3815_v24, 0  ;;  %v2167_v28 = vadd.f32 %v3703_v12, %v2166_v25  ;;  %v2296_v32 = vsel %vm1420_vm4, %v3816_v27, 0 }
 0x7fa   : > { %v4032_v29 = vpop.f32.mrf.mxu0  ;;  %4040 = vmatpush3.bf16.xpose.msra.mxu0 %v2226_v26 }
 0x7fb   : > { %4051 = vmatprep.subr.bf16.mxu0 %v4301_v18  ;;  %v3817_v33 = vpack.c.bf16 %v2167_v28, %v2167_v28  ;;  %v3742_v28 = vld [vmem:[%s4480_s5 + $0x3] ss:$0 sm:$0xff]  ;;  %s4305_s5 = smov 24  }
 0x7fd   : > { %4036 = vmatmul.mubr.msk.bf16.vlgmr.msra.gmra.mxu1 %vm1300_vm3, %v3812_v30  ;;  %v2342_v37 = vsel %vm1420_vm4, %v3817_v33, 0  ;;  %v3720_v30 = vld [vmem:[%s4994_s26 + $0x3] ss:$0 sm:$0xff] }
 0x7fe   : > { %4046 = vmatpush3.bf16.msra.mxu1 %v2296_v32  ;;  %4047 = vmatprep.mubr.msk.bf16.mxu1 %vm4302_vm2, %v4301_v18 }
 0x7ff   : > { %4057 = vmatprep.subr.bf16.mxu1 %v4301_v18 }
 0x801   : > { %4042 = vmatmul.mubr.msk.bf16.vlgmr.msra.gmra.mxu0 %vm1300_vm3, %v3813_v34 }
 0x802   : > { %4052 = vmatpush3.bf16.msra.mxu0 %v2342_v37  ;;  %4053 = vmatprep.mubr.msk.bf16.mxu0 %vm4302_vm2, %v4301_v18 }
 0x803   : > { %4065 = vmatprep.subr.bf16.mxu0 %v4301_v18 }
 0x8bd   : > { %v2216_v39 = vpop.f32.mrf.mxu1 }
 0x8be   : > { %v2268_v40 = vsel %vm1300_vm3, %v2216_v39, -inf }
 0x8bf   : > { %2269 = vmax.xlane.f32.xlu1 %v2268_v40  ;;  %v4037_v41 = vpop.f32.mrf.mxu1 }
 0x8c1   : > { %v2219_v42 = vpop.f32.mrf.mxu1  ;;  %v2262_v43 = vpop.f32.mrf.mxu0 }
 0x8c2   : > { %v2271_v44 = vsel %vm1300_vm3, %v2262_v43, -inf }
 0x8c3   : > { %2272 = vmax.xlane.f32.xlu0 %v2271_v44  ;;  %v4038_v45 = vpop.f32.mrf.mxu1  ;;  %v4043_v46 = vpop.f32.mrf.mxu0 }
 0x8c5   : > { %v2265_v47 = vpop.f32.mrf.mxu0 }
 0x8c7   : > { %v4044_v48 = vpop.f32.mrf.mxu0 }
 0x948   : > { %v2270_v49 = vpop.xlane.xlu1 %2269 }
 0x949   : > { %v2274_v50 = vsub.f32 %v2216_v39, %v2270_v49 }
 0x94b   : > { %v2276_v51 = vmul.f32 1.442695, %v2274_v50 }
 0x94c   : > { %v2273_v52 = vpop.xlane.xlu0 %2272 }
 0x94d   : > { %4227 = vpow2.f32 %v2276_v51  ;;  %v2275_v53 = vsub.f32 %v2262_v43, %v2273_v52 }
 0x94f   : > { %v2278_v54 = vmul.f32 1.442695, %v2275_v53 }
 0x951   : > { %4229 = vpow2.f32 %v2278_v54 }
 0x95a   : > { %v4228_v55 = vpop.eup %4227 }
 0x95b   : > { %v2280_v56 = vsel %vm1300_vm3, %v4228_v55, 0.0 }
 0x95c   : > { %2281 = vadd.xlane.f32.xlu1 %v2280_v56 }
 0x95e   : > { %v4230_v57 = vpop.eup %4229 }
 0x95f   : > { %v2283_v58 = vsel %vm1300_vm3, %v4230_v57, 0.0 }
 0x960   : > { %2284 = vadd.xlane.f32.xlu0 %v2283_v58 }
 0x9e5   : > { %v2282_v59 = vpop.xlane.xlu1 %2281 }
 0x9e6   : > { %4231 = vrcp.f32 %v2282_v59 }
 0x9e9   : > { %v2285_v61 = vpop.xlane.xlu0 %2284 }
 0x9ea   : > { %4233 = vrcp.f32 %v2285_v61 }
 0x9f3   : > { %v4232_v62 = vpop.eup %4231 }
 0x9f4   : > { %v2288_v0 = vmul.f32 %v4232_v62, %v4228_v55 }
 0x9f6   : > { %v2290_v2 = vpack.c.bf16 %v2288_v0, %v2288_v0 }
 0x9f7   : > { %v4234_v3 = vpop.eup %4233 }
 0x9f8   : > { %4048 = vmatmul.mubr.msk.bf16.vlgmr.msra.gmra.mxu1 %vm1300_vm3, %v2290_v2  ;;  %v2289_v4 = vmul.f32 %v4234_v3, %v4230_v57 }
 0x9f9   : > { %4058 = vmatpush3.bf16.msra.mxu1 %v4188_v1  ;;  %4061 = vmatprep.mubr.msk.bf16.mxu1 %vm4302_vm2, %v4301_v18 }
 0x9fa   : > { %v2291_v7 = vpack.c.bf16 %v2289_v4, %v2289_v4  ;;  %4059 = vmatprep.subr.bf16.mxu1 %v4301_v18 }
 0x9fc   : > { %4054 = vmatmul.mubr.msk.bf16.vlgmr.msra.gmra.mxu0 %vm1300_vm3, %v2291_v7 }
 0x9fd   : > { %4060 = vmatpush3.bf16.msra.mxu1 %v4189_v5  ;;  %4066 = vmatpush3.bf16.msra.mxu0 %v4190_v6 }
 0x9fe   : > { %4067 = vmatprep.subr.bf16.mxu0 %v4301_v18  ;;  %4073 = vmatprep.subr.bf16.mxu1 %v4301_v18 }
 0x9ff   : > { %4069 = vmatprep.mubr.msk.bf16.mxu0 %vm4302_vm2, %v4301_v18 }
 0xa00   : > { %4062 = vmatmul.mubr.msk.bf16.vlgmr.msra.gmra.mxu1 %vm1040_vm1, %v4583_v38 }
 0xa01   : > { %4068 = vmatpush3.bf16.msra.mxu0 %v4191_v8  ;;  %4074 = vmatpush3.bf16.msra.mxu1 %v4192_v9 }
 0xa02   : > { %4075 = vmatprep.subr.bf16.mxu1 %v4301_v18  ;;  %4077 = vmatprep.mubr.msk.bf16.mxu1 %vm4302_vm2, %v4301_v18 }
 0xa03   : > { %4081 = vmatprep.subr.bf16.mxu0 %v4301_v18 }
 0xa04   : > { %4070 = vmatmul.mubr.msk.bf16.vlgmr.msra.gmra.mxu0 %vm1040_vm1, %v4583_v38 }
 0xa05   : > { %4076 = vmatpush3.bf16.msra.mxu1 %v4193_v10  ;;  %4083 = vmatprep.mubr.msk.bf16.mxu0 %vm4302_vm2, %v4301_v18 }
 0xa06   : > { %4087 = vmatprep.subr.bf16.mxu1 %v4301_v18 }
 0xa08   : > { %4078 = vmatmul.mubr.msk.bf16.vlgmr.msra.gmra.mxu1 %vm1040_vm1, %v4583_v38 }
 0xa09   : > { %4089 = vmatprep.mubr.msk.bf16.mxu1 %vm4302_vm2, %v4301_v18 }
 0xab8   : > { %v4757_v11 = vpop.f32.mrf.mxu1 }
 0xaba   : > { %v4049_v12 = vpop.f32.mrf.mxu1 }
 0xabc   : > { %v2335_v13 = vpop.f32.mrf.mxu1  ;;  %v4759_v14 = vpop.f32.mrf.mxu0 }
 0xabd   : > { %v3811_v13 = vpack.c.bf16 %v4704_v63, %v4704_v63 }
 0xabe   : > { %v4050_v15 = vpop.f32.mrf.mxu1  ;;  %v4055_v16 = vpop.f32.mrf.mxu0 }
 0xabf   : > { %v3810_v15 = vpack.c.bf16 %v4702_v60, %v4702_v60  ;;  %v3818_v16 = vpack.c.bf16 %v4757_v11, %v4757_v11 }
 0xac0   : > { %v2381_v17 = vpop.f32.mrf.mxu0  ;;  %v2458_v19 = vpop.f32.mrf.mxu1 }
 0xac1   : > { %v2459_v41 = vadd.f32 %v3720_v30, %v2458_v19  ;;  %v3819_v17 = vpack.c.bf16 %v4759_v14, %v4759_v14 }
 0xac2   : > { %v4056_v20 = vpop.f32.mrf.mxu0  ;;  %v4063_v21 = vpop.f32.mrf.mxu1 }
 0xac3   : > { %v3820_v48 = vpack.c.bf16 %v2459_v41, %v2459_v41 }
 0xac4   : > { %v2461_v23 = vpop.f32.mrf.mxu1  ;;  %v2530_v24 = vpop.f32.mrf.mxu0 }
 0xac5   : > { %v2531_v25 = vadd.f32 %v3731_v22, %v2530_v24  ;;  %v2462_v49 = vadd.f32 %v3720_v30, %v2461_v23 }
 0xac6   : > { %v4064_v26 = vpop.f32.mrf.mxu1  ;;  %v4071_v27 = vpop.f32.mrf.mxu0 }
 0xac7   : > { %v3822_v29 = vpack.c.bf16 %v2531_v25, %v2531_v25  ;;  %v3821_v52 = vpack.c.bf16 %v2462_v49, %v2462_v49  ;;  %v4194_v27 = vld [vmem:[%s4490_s20 + $0x8] sm:$0xff]  }
 0xac8   : > { %v2533_v31 = vpop.f32.mrf.mxu0  ;;  %v2602_v32 = vpop.f32.mrf.mxu1 }
 0xac9   : > { %v2619_v33 = vsel %vm1300_vm3, %v3822_v29, 0  ;;  %v2534_v34 = vadd.f32 %v3731_v22, %v2533_v31  ;;  %v2603_v37 = vadd.f32 %v3742_v28, %v2602_v32 }
 0xaca   : > { %v4072_v39 = vpop.f32.mrf.mxu0  ;;  %v4079_v40 = vpop.f32.mrf.mxu1  ;;  %4082 = vmatpush3.bf16.xpose.msra.mxu0 %v2619_v33 }
 0xacb   : > { %v3823_v42 = vpack.c.bf16 %v2534_v34, %v2534_v34  ;;  %4093 = vmatprep.subr.bf16.mxu0 %v4301_v18  ;;  %v3824_v45 = vpack.c.bf16 %v2603_v37, %v2603_v37 }
 0xacc   : > { %v2605_v43 = vpop.f32.mrf.mxu1 }
 0xacd   : > { %v2665_v44 = vsel %vm1300_vm3, %v3823_v42, 0  ;;  %v2606_v46 = vadd.f32 %v3742_v28, %v2605_v43  ;;  %v2735_v50 = vsel %vm1420_vm4, %v3824_v45, 0  ;;  %v4195_v28 = vld [vmem:[%s4490_s20] sm:$0xff]   ;;  %s4995_s20 = sld [smem:[#allocation12_spill]] }
 0xace   : > { %v4080_v47 = vpop.f32.mrf.mxu1  ;;  %4088 = vmatpush3.bf16.xpose.msra.mxu1 %v2665_v44  ;;  %v4197_v44 = vld [vmem:[%s4495_s4 + $0x8] sm:$0xff]  }
 0xacf   : > { %4099 = vmatprep.subr.bf16.mxu1 %v4301_v18  ;;  %v3825_v51 = vpack.c.bf16 %v2606_v46, %v2606_v46  ;;  %v4198_v46 = vld [vmem:[%s4495_s4] sm:$0xff]  }
 0xad1   : > { %4084 = vmatmul.mubr.msk.bf16.vlgmr.msra.gmra.mxu0 %vm1300_vm3, %v3820_v48  ;;  %v2781_v53 = vsel %vm1420_vm4, %v3825_v51, 0 }
 0xad2   : > { %4094 = vmatpush3.bf16.msra.mxu0 %v2735_v50  ;;  %4095 = vmatprep.mubr.msk.bf16.mxu0 %vm4302_vm2, %v4301_v18  ;;  %v3754_v50 = vld [vmem:[%s4997_s9] ss:$0 sm:$0xff]  ;;  %s5004_s9 = sld [smem:[#allocation8_spill]] }
 0xad3   : > { %4105 = vmatprep.subr.bf16.mxu0 %v4301_v18  ;;  %v4199_v47 = vld [vmem:[%s4995_s20 + $0x8] sm:$0xff]   ;;  %v4200_v48 = vld [vmem:[%s4995_s20] sm:$0xff]  }
 0xad5   : > { %4090 = vmatmul.mubr.msk.bf16.vlgmr.msra.gmra.mxu1 %vm1300_vm3, %v3821_v52 }
 0xad6   : > { %4100 = vmatpush3.bf16.msra.mxu1 %v2781_v53  ;;  %4101 = vmatprep.mubr.msk.bf16.mxu1 %vm4302_vm2, %v4301_v18 }
 0xad7   : > { %4113 = vmatprep.subr.bf16.mxu1 %v4301_v18 }
 0xad8   : > { %p3782_p5 = scmp.ne.s32.totalorder %s5004_s9, 3 }
 0xb91   : > { %v2655_v54 = vpop.f32.mrf.mxu0 }
 0xb92   : > { %v2707_v55 = vsel %vm1300_vm3, %v2655_v54, -inf }
 0xb93   : > { %2708 = vmax.xlane.f32.xlu0 %v2707_v55  ;;  %v4085_v56 = vpop.f32.mrf.mxu0 }
 0xb95   : > { %v2658_v57 = vpop.f32.mrf.mxu0  ;;  %v2701_v58 = vpop.f32.mrf.mxu1 }
 0xb96   : > { %v2710_v59 = vsel %vm1300_vm3, %v2701_v58, -inf }
 0xb97   : > { %v4086_v61 = vpop.f32.mrf.mxu0  ;;  %2711 = vmax.xlane.f32.xlu1 %v2710_v59  ;;  %v4091_v62 = vpop.f32.mrf.mxu1 }
 0xb98   : > { %v3765_v62 = vld [vmem:[%s4998_s2] ss:$0 sm:$0xff] }
 0xb99   : > { %v2704_v0 = vpop.f32.mrf.mxu1 }
 0xb9b   : > { %v4092_v1 = vpop.f32.mrf.mxu1 }
 0xc1c   : > { %v2709_v2 = vpop.xlane.xlu0 %2708 }
 0xc1d   : > { %v2713_v3 = vsub.f32 %v2655_v54, %v2709_v2 }
 0xc1f   : > { %v2715_v4 = vmul.f32 1.442695, %v2713_v3 }
 0xc20   : > { %v2712_v5 = vpop.xlane.xlu1 %2711 }
 0xc21   : > { %4235 = vpow2.f32 %v2715_v4  ;;  %v2714_v6 = vsub.f32 %v2701_v58, %v2712_v5 }
 0xc23   : > { %v2717_v7 = vmul.f32 1.442695, %v2714_v6 }
 0xc25   : > { %4237 = vpow2.f32 %v2717_v7 }
 0xc2e   : > { %v4236_v8 = vpop.eup %4235 }
 0xc2f   : > { %v2719_v9 = vsel %vm1300_vm3, %v4236_v8, 0.0 }
 0xc30   : > { %2720 = vadd.xlane.f32.xlu0 %v2719_v9 }
 0xc32   : > { %v4238_v10 = vpop.eup %4237 }
 0xc33   : > { %v2722_v12 = vsel %vm1300_vm3, %v4238_v10, 0.0 }
 0xc34   : > { %2723 = vadd.xlane.f32.xlu1 %v2722_v12 }
 0xc45   : > { %1953 = vrot.lane.b32.xlu1 %v3811_v13, %s4303_s30 }
 0xc46   : > { %1951 = vrot.lane.b32.xlu0 %v3810_v15, %s4303_s30 }
 0xc49   : > { %2390 = vrot.lane.b32.xlu1 %v3818_v16, %s4304_s6 }
 0xc4d   : > { %2392 = vrot.lane.b32.xlu1 %v3819_v17, %s4304_s6 }
 0xcb9   : > { %v2721_v19 = vpop.xlane.xlu0 %2720 }
 0xcba   : > { %4239 = vrcp.f32 %v2721_v19 }
 0xcbd   : > { %v1952_v63 = vpop.permute.xlu0 %1951  ;;  %v2724_v20 = vpop.xlane.xlu1 %2723 }
 0xcbe   : > { %1958 = vst.msk [vmem:[#allocation3] sm:$0xf] %vm1957_vm6, %v1952_v63  ;;  %4241 = vrcp.f32 %v2724_v20 }
 0xcc1   : > { %v1954_v60 = vpop.permute.xlu1 %1953 }
 0xcc2   : > { %1959 = vst.msk [vmem:[#allocation3 + $0x4] sm:$0xf] %vm1957_vm6, %v1954_v60 }
 0xcc5   : > { %v2391_v21 = vpop.permute.xlu1 %2390 }
 0xcc6   : > { %2397 = vst.msk [vmem:[#allocation3] sm:$0xf] %vm2396_vm7, %v2391_v21 }
 0xcc7   : > { %v4240_v11 = vpop.eup %4239 }
 0xcc8   : > { %v2727_v22 = vmul.f32 %v4240_v11, %v4236_v8 }
 0xcc9   : > { %v2393_v23 = vpop.permute.xlu1 %2392 }
 0xcca   : > { %2398 = vst.msk [vmem:[#allocation3 + $0x4] sm:$0xf] %vm2396_vm7, %v2393_v23  ;;  %v2729_v14 = vpack.c.bf16 %v2727_v22, %v2727_v22 }
 0xccb   : > { %v4242_v24 = vpop.eup %4241 }
 0xccc   : > { %4096 = vmatmul.mubr.msk.bf16.vlgmr.msra.gmra.mxu0 %vm1300_vm3, %v2729_v14  ;;  %v2728_v25 = vmul.f32 %v4242_v24, %v4238_v10 }
 0xccd   : > { %4109 = vmatprep.mubr.msk.bf16.mxu0 %vm4302_vm2, %v4301_v18  ;;  %4106 = vmatpush3.bf16.msra.mxu0 %v4194_v27 }
 0xcce   : > { %v2730_v26 = vpack.c.bf16 %v2728_v25, %v2728_v25  ;;  %4107 = vmatprep.subr.bf16.mxu0 %v4301_v18 }
 0xcd0   : > { %4102 = vmatmul.mubr.msk.bf16.vlgmr.msra.gmra.mxu1 %vm1300_vm3, %v2730_v26 }
 0xcd1   : > { %4117 = vmatprep.mubr.msk.bf16.mxu1 %vm4302_vm2, %v4301_v18  ;;  %4108 = vmatpush3.bf16.msra.mxu0 %v4195_v28 }
 0xcd2   : > { %4121 = vmatprep.subr.bf16.mxu0 %v4301_v18  ;;  %4114 = vmatpush3.bf16.msra.mxu1 %v4199_v47 }
 0xcd3   : > { %4115 = vmatprep.subr.bf16.mxu1 %v4301_v18 }
 0xcd6   : > { %4116 = vmatpush3.bf16.msra.mxu1 %v4200_v48 }
 0xcd7   : > { %4129 = vmatprep.subr.bf16.mxu1 %v4301_v18 }
 0xd8c   : > { %v2771_v29 = vpop.f32.mrf.mxu0 }
 0xd8d   : > { %v3826_v30 = vpack.c.bf16 %v2771_v29, %v2771_v29 }
 0xd8e   : > { %v4097_v31 = vpop.f32.mrf.mxu0 }
 0xd8f   : > { %2829 = vrot.lane.b32.xlu0 %v3826_v30, %s4305_s5 }
 0xd90   : > { %v2774_v32 = vpop.f32.mrf.mxu0  ;;  %v2817_v33 = vpop.f32.mrf.mxu1 }
 0xd91   : > { %v3827_v34 = vpack.c.bf16 %v2817_v33, %v2817_v33 }
 0xd92   : > { %v4098_v37 = vpop.f32.mrf.mxu0  ;;  %v4103_v39 = vpop.f32.mrf.mxu1 }
 0xd93   : > { %2831 = vrot.lane.b32.xlu1 %v3827_v34, %s4305_s5  ;;  %v3768_v37 = vld [vmem:[%s4999_s21] ss:$0 sm:$0xff]  ;;  %s5001_s5 = sld [smem:[#allocation26_spill]] }
 0xd94   : > { %v2820_v40 = vpop.f32.mrf.mxu1 }
 0xd95   : > { %v3769_v40 = vld [vmem:[%s5000_s12] ss:$0 sm:$0xff] }
 0xd96   : > { %v4104_v41 = vpop.f32.mrf.mxu1 }
 0xe01   : > { %v2830_v42 = vpop.permute.xlu0 %2829 }
 0xe02   : > { %2836 = vst.msk [vmem:[#allocation3] sm:$0xf] %vm2835_vm8, %v2830_v42 }
 0xe05   : > { %v2832_v43 = vpop.permute.xlu1 %2831 }
 0xe06   : > { %2837 = vst.msk [vmem:[#allocation3 + $0x4] sm:$0xf] %vm2835_vm8, %v2832_v43 }
 0xe0d   : > { %v4196_v45 = vld [vmem:[#allocation3] sm:$0xff]  }
 0xe0e   : > { %4110 = vmatmul.mubr.msk.bf16.vlgmr.msra.gmra.mxu0 %vm1040_vm1, %v4196_v45  ;;  %v4263_v45 = vld [vmem:[#allocation2] sm:$0xff] }
 0xe0f   : > { %4122 = vmatpush3.bf16.msra.mxu0 %v4197_v44  ;;  %4125 = vmatprep.mubr.msk.bf16.mxu0 %vm4302_vm2, %v4301_v18 }
 0xe10   : > { %4123 = vmatprep.subr.bf16.mxu0 %v4301_v18 }
 0xe13   : > { %4124 = vmatpush3.bf16.msra.mxu0 %v4198_v46 }
 0xe14   : > { %4137 = vmatprep.subr.bf16.mxu0 %v4301_v18 }
 0xe16   : > { %4126 = vmatmul.mubr.msk.bf16.vlgmr.msra.gmra.mxu0 %vm1040_vm1, %v4583_v38 }
 0xe17   : > { %4145 = vmatprep.mubr.msk.bf16.mxu0 %vm4302_vm2, %v4301_v18 }
 0xece   : > { %v2905_v49 = vpop.f32.mrf.mxu0 }
 0xecf   : > { %v2906_v52 = vadd.f32 %v3754_v50, %v2905_v49 }
 0xed0   : > { %v4111_v51 = vpop.f32.mrf.mxu0 }
 0xed2   : > { %v2908_v38 = vpop.f32.mrf.mxu0 }
 0xed3   : > { %v2909_v53 = vadd.f32 %v3754_v50, %v2908_v38  ;;  %v4264_v50 = vld [vmem:[#allocation2 + $0x8] sm:$0xff] }
 0xed4   : > { %v4112_v54 = vpop.f32.mrf.mxu0 }
 0xed5   : > { %v2916_v55 = vpack.c.bf16 %v2909_v53, %v2906_v52 }
 0xed6   : > { %v3023_v56 = vpop.f32.mrf.mxu0 }
 0xed7   : > { %4118 = vmatmul.mubr.msk.bf16.vlgmr.msra.gmra.mxu1 %vm1040_vm1, %v2916_v55 }
 0xed8   : > { %v4127_v57 = vpop.f32.mrf.mxu0  ;;  %4133 = vmatprep.mubr.msk.bf16.mxu1 %vm4302_vm2, %v4301_v18 }
 0xeda   : > { %v3026_v58 = vpop.f32.mrf.mxu0 }
 0xedc   : > { %v4128_v59 = vpop.f32.mrf.mxu0 }
 0xf97   : > { %v2970_v61 = vpop.f32.mrf.mxu1 }
 0xf98   : > { %v3024_v0 = vadd.f32 %v3023_v56, %v2970_v61 }
 0xf99   : > { %v4119_v1 = vpop.f32.mrf.mxu1 }
 0xf9a   : > { %v3037_v2 = vadd.f32 %v3765_v62, %v3024_v0  ;;  %v4201_v0 = vld [vmem:[%s4525_s22 + $0x8] sm:$0xff]   ;;  %v4202_v1 = vld [vmem:[%s4525_s22] sm:$0xff]   ;;  %s5002_s22 = scalar_lea.vmem %s5001_s5, %s4440_s24  ;;  %s5005_s24 = sld [smem:[#allocation29_spill]] (!%p3782_p5) }
 0xf9b   : > { %v2973_v3 = vpop.f32.mrf.mxu1  ;;  %4130 = vmatpush3.bf16.msra.mxu1 %v4201_v0 }
 0xf9c   : > { %v3766_v4 = vmul.f32 -1.442695, %v3037_v2  ;;  %v3027_v5 = vadd.f32 %v3026_v58, %v2973_v3  ;;  %4131 = vmatprep.subr.bf16.mxu1 %v4301_v18 }
 0xf9d   : > { %v4120_v6 = vpop.f32.mrf.mxu1 }
 0xf9e   : > { %4243 = vpow2.f32 %v3766_v4  ;;  %v3038_v7 = vadd.f32 %v3765_v62, %v3027_v5 }
 0xf9f   : > { %4132 = vmatpush3.bf16.msra.mxu1 %v4202_v1 }
 0xfa0   : > { %v3767_v8 = vmul.f32 -1.442695, %v3038_v7 }
 0xfa2   : > { %4245 = vpow2.f32 %v3767_v8 }
 0xfab   : > { %v4244_v9 = vpop.eup %4243 }
 0xfac   : > { %v3045_v10 = vadd.f32 1.0, %v4244_v9 }
 0xfae   : > { %4247 = vrcp.f32 %v3045_v10  ;;  %v3770_v10 = vld [vmem:[%s5002_s22] ss:$0 sm:$0xff] }
 0xfaf   : > { %v4246_v12 = vpop.eup %4245 }
 0xfb0   : > { %v3046_v13 = vadd.f32 1.0, %v4246_v12 }
 0xfb2   : > { %4249 = vrcp.f32 %v3046_v13 }
 0xfbb   : > { %v4248_v15 = vpop.eup %4247 }
 0xfbc   : > { %v3051_v16 = vmul.f32 %v4248_v15, %v2906_v52 }
 0xfbe   : > { %v3053_v17 = vadd.f32 %v3051_v16, %v4576_v35  ;;  %v3771_v16 = vld [vmem:[%s1011_s0] ss:$0 sm:$0xff] }
 0xfbf   : > { %v4250_v19 = vpop.eup %4249 }
 0xfc0   : > { %v3055_v63 = vsel %vm1040_vm1, %v3053_v17, 0.0  ;;  %v3052_v20 = vmul.f32 %v4250_v19, %v2909_v53 }
 0xfc1   : > { %3056 = vadd.xlane.f32.xlu0 %v3055_v63 }
 0xfc2   : > { %v3054_v60 = vadd.f32 %v3052_v20, %v4578_v36 }
 0xfc4   : > { %v3058_v21 = vsel %vm1040_vm1, %v3054_v60, 0.0 }
 0xfc5   : > { %3059 = vadd.xlane.f32.xlu1 %v3058_v21  ;;  %v4204_v21 = vld [vmem:[%s4539_s16 + $0x10] sm:$0xff]  }
0x104a   : > { %v3057_v11 = vpop.xlane.xlu0 %3056 }
0x104b   : > { %v3061_v22 = vmul.f32 0.03125, %v3057_v11  ;;  %v4205_v11 = vld [vmem:[%s4539_s16 + $0x8] sm:$0xff]  }
0x104d   : > { %v3063_v23 = vsub.f32 %v3053_v17, %v3061_v22  ;;  %v4206_v22 = vld [vmem:[%s4539_s16] sm:$0xff]  }
0x104e   : > { %v3060_v14 = vpop.xlane.xlu1 %3059 }
0x104f   : > { %v3062_v24 = vmul.f32 0.03125, %v3060_v14  ;;  %v3065_v25 = vmul.f32 %v3063_v23, %v3063_v23 }
0x1051   : > { %v3064_v26 = vsub.f32 %v3054_v60, %v3062_v24  ;;  %v3067_v35 = vsel %vm1040_vm1, %v3065_v25, 0.0  ;;  %v4203_v60 = vld [vmem:[%s4539_s16 + $0x18] sm:$0xff]  }
0x1052   : > { %3068 = vadd.xlane.f32.xlu0 %v3067_v35  ;;  %4138 = vmatpush3.bf16.msra.mxu0 %v4203_v60 }
0x1053   : > { %v3066_v27 = vmul.f32 %v3064_v26, %v3064_v26  ;;  %4139 = vmatprep.subr.bf16.mxu0 %v4301_v18 }
0x1055   : > { %v3070_v28 = vsel %vm1040_vm1, %v3066_v27, 0.0 }
0x1056   : > { %3071 = vadd.xlane.f32.xlu0 %v3070_v28  ;;  %4140 = vmatpush3.bf16.msra.mxu0 %v4204_v21 }
0x1057   : > { %4141 = vmatprep.subr.bf16.mxu0 %v4301_v18 }
0x105a   : > { %4142 = vmatpush3.bf16.msra.mxu0 %v4205_v11 }
0x105b   : > { %4143 = vmatprep.subr.bf16.mxu0 %v4301_v18 }
0x105e   : > { %4144 = vmatpush3.bf16.msra.mxu0 %v4206_v22 }
0x10db   : > { %v3069_v36 = vpop.xlane.xlu0 %3068 }
0x10dc   : > { %v3073_v29 = vmul.f32 0.03125, %v3069_v36 }
0x10de   : > { %v3075_v30 = vadd.f32 1e-05, %v3073_v29 }
0x10df   : > { %v3072_v31 = vpop.xlane.xlu0 %3071 }
0x10e0   : > { %4251 = vrsqrt.f32 %v3075_v30  ;;  %v3074_v32 = vmul.f32 0.03125, %v3072_v31 }
0x10e2   : > { %v3076_v33 = vadd.f32 1e-05, %v3074_v32 }
0x10e4   : > { %4253 = vrsqrt.f32 %v3076_v33 }
0x10ed   : > { %v4252_v34 = vpop.eup %4251 }
0x10ee   : > { %v3079_v39 = vmul.f32 %v4252_v34, %v3063_v23  ;;  %v3772_v23 = vld [vmem:[%s1019_s1] ss:$0 sm:$0xff] }
0x10f0   : > { %v3088_v41 = vmul.f32 %v3768_v37, %v3079_v39 }
0x10f1   : > { %v4254_v42 = vpop.eup %4253 }
0x10f2   : > { %v3097_v43 = vadd.f32 %v3769_v40, %v3088_v41  ;;  %v3080_v44 = vmul.f32 %v4254_v42, %v3064_v26  ;;  %v3781_v41 = vld [vmem:[%s1027_s28] ss:$0 sm:$0xff] }
0x10f4   : > { %v4846_v46 = vadd.f32 %v4263_v45, %v3097_v43  ;;  %v3089_v47 = vmul.f32 %v3768_v37, %v3080_v44 }
0x10f6   : > { %v3101_v48 = vsel %vm1040_vm1, %v4846_v46, 0.0  ;;  %v3098_v49 = vadd.f32 %v3769_v40, %v3089_v47 }
0x10f7   : > { %3102 = vadd.xlane.f32.xlu0 %v3101_v48 }
0x10f8   : > { %v4850_v51 = vadd.f32 %v4264_v50, %v3098_v49 }
0x10fa   : > { %v3104_v38 = vsel %vm1040_vm1, %v4850_v51, 0.0 }
0x10fb   : > { %3105 = vadd.xlane.f32.xlu1 %v3104_v38 }
0x1180   : > { %v3103_v52 = vpop.xlane.xlu0 %3102 }
0x1181   : > { %v3107_v53 = vmul.f32 0.03125, %v3103_v52 }
0x1183   : > { %v3109_v54 = vsub.f32 %v4846_v46, %v3107_v53 }
0x1184   : > { %v3106_v55 = vpop.xlane.xlu1 %3105 }
0x1185   : > { %v3108_v56 = vmul.f32 0.03125, %v3106_v55  ;;  %v3111_v57 = vmul.f32 %v3109_v54, %v3109_v54 }
0x1187   : > { %v3110_v58 = vsub.f32 %v4850_v51, %v3108_v56  ;;  %v3113_v59 = vsel %vm1040_vm1, %v3111_v57, 0.0 }
0x1188   : > { %3114 = vadd.xlane.f32.xlu0 %v3113_v59 }
0x1189   : > { %v3112_v61 = vmul.f32 %v3110_v58, %v3110_v58 }
0x118b   : > { %v3116_v62 = vsel %vm1040_vm1, %v3112_v61, 0.0 }
0x118c   : > { %3117 = vadd.xlane.f32.xlu1 %v3116_v62 }
0x1211   : > { %v3115_v2 = vpop.xlane.xlu0 %3114 }
0x1212   : > { %v3119_v3 = vmul.f32 0.03125, %v3115_v2 }
0x1214   : > { %v3121_v4 = vadd.f32 1e-05, %v3119_v3 }
0x1215   : > { %v3118_v5 = vpop.xlane.xlu1 %3117 }
0x1216   : > { %4255 = vrsqrt.f32 %v3121_v4  ;;  %v3120_v6 = vmul.f32 0.03125, %v3118_v5 }
0x1218   : > { %v3122_v7 = vadd.f32 1e-05, %v3120_v6 }
0x121a   : > { %4257 = vrsqrt.f32 %v3122_v7 }
0x1223   : > { %v4256_v8 = vpop.eup %4255 }
0x1224   : > { %v3125_v9 = vmul.f32 %v4256_v8, %v3109_v54 }
0x1226   : > { %v3134_v15 = vmul.f32 %v3770_v10, %v3125_v9 }
0x1227   : > { %v4258_v12 = vpop.eup %4257 }
0x1228   : > { %v3126_v13 = vmul.f32 %v4258_v12, %v3110_v58  ;;  %v3143_v19 = vadd.f32 %v3771_v16, %v3134_v15 }
0x122a   : > { %v3135_v17 = vmul.f32 %v3770_v10, %v3126_v13 }
0x122c   : > { %v3144_v63 = vadd.f32 %v3771_v16, %v3135_v17 }
0x122e   : > { %v3145_v20 = vpack.c.bf16 %v3144_v63, %v3143_v19 }
0x1230   : > { %4134 = vmatmul.mubr.msk.bf16.vlgmr.msra.gmra.mxu1 %vm1040_vm1, %v3145_v20 }
0x12f0   : > { %v3206_v14 = vpop.f32.mrf.mxu1 }
0x12f1   : > { %v3207_v24 = vadd.f32 %v3772_v23, %v3206_v14 }
0x12f2   : > { %v4135_v25 = vpop.f32.mrf.mxu1 }
0x12f3   : > { %v3215_v26 = vmul.f32 0.70710677, %v3207_v24  ;;  %v3213_v31 = vmul.f32 0.5, %v3207_v24 }
0x12f4   : > { %v3209_v35 = vpop.f32.mrf.mxu1 }
0x12f5   : > { %4259 = verf.f32 %v3215_v26  ;;  %v3210_v27 = vadd.f32 %v3772_v23, %v3209_v35 }
0x12f6   : > { %v4136_v28 = vpop.f32.mrf.mxu1 }
0x12f7   : > { %v3216_v36 = vmul.f32 0.70710677, %v3210_v27  ;;  %v3214_v32 = vmul.f32 0.5, %v3210_v27 }
0x12f9   : > { %4261 = verf.f32 %v3216_v36 }
0x1302   : > { %v4260_v29 = vpop.eup %4259 }
0x1303   : > { %v3219_v18 = vadd.f32 1.0, %v4260_v29 }
0x1305   : > { %v3221_v34 = vmul.f32 %v3219_v18, %v3213_v31 }
0x1306   : > { %v4262_v30 = vpop.eup %4261 }
0x1307   : > { %v3220_v33 = vadd.f32 1.0, %v4262_v30 }
0x1309   : > { %v3222_v37 = vmul.f32 %v3220_v33, %v3214_v32 }
0x130b   : > { %v3223_v39 = vpack.c.bf16 %v3222_v37, %v3221_v34 }
0x130d   : > { %4146 = vmatmul.mubr.msk.bf16.vlgmr.msra.gmra.mxu0 %vm3256_vm9, %v3223_v39 }
0x13cd   : > { %v3294_v40 = vpop.f32.mrf.mxu0 }
0x13ce   : > { %v3301_v42 = vadd.f32 %v3294_v40, %v4846_v46 }
0x13cf   : > { %v4147_v43 = vpop.f32.mrf.mxu0 }
0x13d0   : > { %v3310_v44 = vadd.f32 %v3781_v41, %v3301_v42 }
0x13d1   : > { %v3297_v45 = vpop.f32.mrf.mxu0 }
0x13d2   : > { %3312 = vst.msk [vmem:[#allocation2] sm:$0xff] %vm1040_vm1, %v3310_v44  ;;  %v3302_v47 = vadd.f32 %v3297_v45, %v4850_v51  ;;  %3317 = sbr.rel (%p3782_p5) target bundleno = 5083 (0x13db), region = 120 }
0x13d3   : > { %v4148_v48 = vpop.f32.mrf.mxu0 }
0x13d4   : > { %v3311_v49 = vadd.f32 %v3781_v41, %v3302_v47 }
0x13d6   : > { %3313 = vst.msk [vmem:[#allocation2 + $0x8] sm:$0xff] %vm1040_vm1, %v3311_v49 }
0x13d7   : > { %v3783_v50 = vld [vmem:[%s5005_s24] ss:$0 sm:$0xff] }
0x13d8   : > { %v3325_v38 = vadd.f32 %v3783_v50, %v3310_v44  ;;  %v3326_v46 = vadd.f32 %v3783_v50, %v3311_v49 }
0x13da   : > { %3327 = vst.msk [vmem:[#allocation4] sm:$0xff] %vm1040_vm1, %v3325_v38  ;;  %3328 = vst.msk [vmem:[#allocation4 + $0x8] sm:$0xff] %vm1040_vm1, %v3326_v46 }
0x13db PF: > { %s5006_s28 = sld [smem:[#allocation8_spill]]  ;;  %s4306_s2 = smov [#allocation4]  }
0x13dc   : > { %s3335_s8 = sshll.u32 %s4306_s2, 4  ;;  %s3336_s8 = int_to_ptr.vmem [resolvable:$true] %s3335_s8 }
0x13dd   : > { %s4265_s27 = scalar_lea.vmem %s3336_s8, 256  ;;  %p4272_p10 = scmp.lt.s32.totalorder %s3336_s8, %s3336_s8 }
0x13de   : > { %p4266_p7 = scmp.ne.s32.totalorder %s3336_s8, %s4265_s27  ;;  %p4273_p11 = scmp.lt.s32.totalorder %s4265_s27, %s4265_s27 }
0x13e0   : > { %p4274_p12 = por %p4273_p11, %p4272_p10 }
0x13e1   : > { %p4153_p6 = scmp.eq.s32.totalorder %s5006_s28, 3 }
0x13e3   : > { %p4267_p8 = pnand %p4266_p7, %p4153_p6 }
0x13e5   : > { %p4268_p9 = pneg %p4267_p8 }
0x13e7   : > { %p4275_p13 = pnand %p4274_p12, %p4268_p9 }
0x13e9   : > { %4278 = shalt.err (!%p4275_p13)
}
0x13ea   : > { %s4307_s21 = smov 128   ;;  %s5007_s12 = sld [smem:[#allocation30_spill]] }
0x13f0   : > { %4150 = dma.vmem_to_hbm [thread:$0]  (%p4153_p6), %s3336_s8, 256, %s5007_s12, [#allocation5], %s4307_s21, %s4307_s21, %s4303_s30  }
0x13f1   : > { %4294 = dma.done.wait (%p4153_p6), [#allocation5], 256  }
0x13f2   : > { %4296 = vsyncadd (%p4153_p6), [#allocation5], 4294967040 }
0x13f3 PF: > { %s5008_s26 = sld [smem:[#allocation7_spill]] }
0x13f9   : > { %s34_s4 = sadd.s32 1, %s5008_s26  }
0x13fa   : > { %p31_p0 = scmp.ge.s32.totalorder %s34_s4, 6  }
0x13fc   :  { %33 = sbr.rel (!%p31_p0) target bundleno = 20 (0x14), region = 225 }
0x1401   :  { %3351 = vsyncpa [#allocation5], 1 }
0x1402   :  { %3353 = vsyncpa [#allocation5 + $0x1], 1 }

</bundles_post_ra>
